<compile_context>
chip_gen: v6e
topology: v6e:2x2x1
jax: 0.10.0
libtpu: 0.0.40
codegen_flags: <defaults>
</compile_context>

<pallas_src>
import functools
import math

import jax
import jax.numpy as jnp
from jax import lax
from jax.experimental import pallas as pl
from jax.experimental.pallas import tpu as pltpu


# ---------------------------------------------------------------------------
# Pallas kernel: chunked fused kernel_regression (implicit values) + lightning attn
# ---------------------------------------------------------------------------
def _iva_chunk_kernel(cb_col_ref, cb_row_ref, q_ref, k_ref, v_ref, o_ref,
                      s_ref, *, sub_block, mm_dtype):
    C, Dh = q_ref.shape
    ci = pl.program_id(2)
    f32 = jnp.float32

    # Fresh recurrent state at the start of each (batch, head) sequence.
    @pl.when(ci == 0)
    def _():
        s_ref[...] = jnp.zeros_like(s_ref)

    def mm(a, b):                       # a @ b   (bf16 operands, f32 accumulate)
        return jnp.dot(a.astype(mm_dtype), b.astype(mm_dtype),
                       preferred_element_type=f32)

    def mm_nt(a, b):                    # a @ b.T (no explicit transpose)
        return lax.dot_general(a.astype(mm_dtype), b.astype(mm_dtype),
                               (((1,), (1,)), ((), ())),
                               preferred_element_type=f32)

    # Per-chunk activations applied to the freshly DMA'd blocks.
    q = jax.nn.silu(q_ref[...].astype(f32))
    k = jax.nn.silu(k_ref[...].astype(f32))
    k = k * lax.rsqrt(jnp.sum(k * k, axis=-1, keepdims=True) + 1e-12)
    v = v_ref[...].astype(f32)

    cb_col = cb_col_ref[...]            # (C,2): [:,0]=cum log-decay c_t, [:,1]=beta_t
    cb_row = cb_row_ref[...]            # (2,C): same values in lane layout
    c_col = cb_col[:, 0:1]              # (C,1)
    b_col = cb_col[:, 1:2]              # (C,1)
    c_row = cb_row[0:1, :]              # (1,C)
    b_row = cb_row[1:2, :]              # (1,C)

    A = jnp.exp(c_col)                  # (C,1)  A_t = prod_{s<=t} a_s

    rows = lax.broadcasted_iota(jnp.int32, (C, C), 0)
    cols = lax.broadcasted_iota(jnp.int32, (C, C), 1)
    # Mask BEFORE the exp (exp(-inf) == 0 exactly; no upper-triangle overflow).
    r_strict = jnp.exp(jnp.where(cols < rows, c_col - c_row, -jnp.inf))  # s <  t

    kk = mm_nt(k, k)                    # (C,C)  k_t . k_s
    t_mat = r_strict * b_row * kk       # T[t,s] = (A_t/A_s) b_s (k_t.k_s), s<t

    s0 = s_ref[...]                     # (Dh,Dh) state entering this chunk
    rhs = v - mm(A * k, s0)             # V - diag(A) K S0

    # ---- u = (I+T)^{-1} rhs via blocked forward substitution ----------------
    # Outer steps: dense (Bc, i*Bc) x (i*Bc, Dh) MXU matmuls against already
    # solved rows; diagonal (Bc,Bc) blocks inverted with nilpotent doubling:
    # (I + N)^-1 = I + P + P^2 + ... with P = -N (strictly lower), built with
    # ~log2(Bc) tiny matmuls.  No per-row recursion, no (C,C) scratch reloads.
    Bc = sub_block
    nb = C // Bc
    n_dbl = max(int(math.ceil(math.log2(max(Bc, 1)))) - 1, 0)
    u = None
    for i in range(nb):
        lo = i * Bc
        r_i = rhs[lo:lo + Bc, :]
        if i > 0:
            r_i = r_i - mm(t_mat[lo:lo + Bc, :lo], u)
        p_blk = -t_mat[lo:lo + Bc, lo:lo + Bc]
        x_blk = p_blk
        q_blk = p_blk
        for _ in range(n_dbl):
            q_blk = mm(q_blk, q_blk)
            x_blk = x_blk + q_blk + mm(q_blk, x_blk)
        u_i = r_i + mm(x_blk, r_i)                  # (I + T_bb)^-1 r_i
        u = u_i if u is None else jnp.concatenate([u, u_i], axis=0)

    # ---- intra-chunk output: p_mat built only after the solve ---------------
    eye = jnp.where(rows == cols, jnp.float32(1.0), jnp.float32(0.0))
    p_mat = (r_strict + eye) * b_row * mm_nt(q, k)  # P[t,s]=(A_t/A_s) b_s (q_t.k_s), s<=t
    o = mm(A * q, s0) + mm(p_mat, u)
    o_ref[...] = o.astype(o_ref.dtype)

    # ---- cross-chunk state update (single state: S1 == S2 for zero init) ----
    c_last = c_col[C - 1, 0]
    w_end = jnp.exp(c_last - c_col) * b_col * k     # (C,Dh)
    s_ref[...] = jnp.exp(c_last) * s0 + lax.dot_general(
        w_end.astype(mm_dtype), u.astype(mm_dtype),
        (((0,), (0,)), ((), ())), preferred_element_type=f32)


def _default_chunk(n):
    """256 on v6e/v7x (2x256^2 MXU), 128 on v5e; largest pow-2 divisor of n."""
    try:
        kind = jax.devices()[0].device_kind.lower()
    except Exception:  # pragma: no cover
        kind = ""
    target = 128 if "v5" in kind else 256
    c = 1
    while c < target and n % (2 * c) == 0:
        c *= 2
    return c


def iva_recurrence(q, k, v, log_f, beta, *, num_heads, chunk=None, sub_block=32,
                   matmul_dtype=jnp.bfloat16, out_dtype=jnp.float32):
    """Chunked implicit-value (delta-rule) recurrence.

    q, k, v : (B, N, D) pre-activation projections, heads packed along the last
              dim (D = num_heads * head_dim); f32 or bf16.
    log_f   : (B, N, H) log-sigmoid decay logits (f32).
    beta    : (B, N, H) per-token learning rates (f32).
    Returns the mixed output in the same packed (B, N, D) layout.

    matmul_dtype defaults to bf16 (MXU-native on v5e/v6e/v7x, f32 accumulation);
    pass jnp.float32 for tight validation.  out_dtype may be set to bf16 for
    production (feeds an RMSNorm).
    """
    B, N, D = q.shape
    H = num_heads
    Dh = D // H
    assert D == H * Dh
    if chunk is None:
        chunk = _default_chunk(N)
    chunk = min(chunk, N)
    assert N % chunk == 0, "sequence length must be a multiple of the chunk size"
    nc = N // chunk
    Bc = min(sub_block, chunk)
    while chunk % Bc:
        Bc -= 1

    # Within-chunk cumulative log-decay + beta, packed into ONE (C,2) column
    # block and ONE (2,C) row block per grid step (2 small DMAs instead of 4).
    # These tensors are ~D/(2H) x smaller than q/k/v, so this transpose is cheap.
    logf = log_f.astype(jnp.float32).transpose(0, 2, 1).reshape(B, H, nc, chunk)
    c = jnp.cumsum(logf, axis=-1)
    bet = beta.astype(jnp.float32).transpose(0, 2, 1).reshape(B, H, nc, chunk)
    cb_col = jnp.stack([c, bet], axis=-1).reshape(B, H, N, 2)
    cb_row = jnp.stack([c, bet], axis=-2)                     # (B,H,nc,2,chunk)

    col_spec = pl.BlockSpec((None, None, chunk, 2), lambda b, h, ci: (b, h, ci, 0))
    row_spec = pl.BlockSpec((None, None, None, 2, chunk),
                            lambda b, h, ci: (b, h, ci, 0, 0))

    kernel = functools.partial(_iva_chunk_kernel, sub_block=Bc,
                               mm_dtype=matmul_dtype)
    grid = (B, H, nc)
    # Megacore: B/H parallel (keep B*H even on v7x), state-carrying axis arbitrary.
    cparams = pltpu.CompilerParams(
        dimension_semantics=("parallel", "parallel", "arbitrary"))
    scratch = [pltpu.VMEM((Dh, Dh), jnp.float32)]   # recurrent state (S1 == S2)

    if Dh % 128 == 0 or H == 1:
        # Heads are sliced along the lane axis of the packed (B,N,D) tensors by
        # the index_map: no wrapper transposes on q/k/v and a lane-dense
        # (chunk, Dh) output store straight into the packed (B,N,D) slab.
        # (If a trace shows exposed DMA on v7x, add pipeline_mode=pl.Buffered(3).)
        qkv_spec = pl.BlockSpec((None, chunk, Dh), lambda b, h, ci: (b, ci, h))
        return pl.pallas_call(
            kernel,
            out_shape=jax.ShapeDtypeStruct((B, N, D), out_dtype),
            grid=grid,
            in_specs=[col_spec, row_spec, qkv_spec, qkv_spec, qkv_spec],
            out_specs=qkv_spec,
            scratch_shapes=scratch,
            compiler_params=cparams,
        )(cb_col, cb_row, q, k, v)

    # TODO(synk): for head_dim < 128 pack several heads per grid step so the
    # stored tile stays lane-dense; for now fall back to a head-split layout.
    def split(t):
        return t.reshape(B, N, H, Dh).transpose(0, 2, 1, 3)

    blk = pl.BlockSpec((None, None, chunk, Dh), lambda b, h, ci: (b, h, ci, 0))
    out = pl.pallas_call(
        kernel,
        out_shape=jax.ShapeDtypeStruct((B, H, N, Dh), out_dtype),
        grid=grid,
        in_specs=[col_spec, row_spec, blk, blk, blk],
        out_specs=blk,
        scratch_shapes=scratch,
        compiler_params=cparams,
    )(cb_col, cb_row, split(q), split(k), split(v))
    return out.transpose(0, 2, 1, 3).reshape(B, N, D)


# ---------------------------------------------------------------------------
# Plain-JAX glue: projections, norm, output projection
# ---------------------------------------------------------------------------
def _project(x, params):
    q = x @ params["Wq"].T
    k = x @ params["Wk"].T
    v = x @ params["Wv"].T
    f = x @ params["Wf"].T                                   # (B,N,H)
    beta = 2.0 * jax.nn.sigmoid(x @ params["Wbet"].T)        # (B,N,H)
    log_f = jax.nn.log_sigmoid(f.astype(jnp.float32))
    return q, k, v, log_f, beta


def implicit_value_attention_forward(x, params, num_heads, *, chunk=None,
                                     sub_block=32, matmul_dtype=jnp.bfloat16):
    # TODO(synk): past_key_values / attention_mask decode paths are not
    # implemented; this is the full-mask prefill forward.
    B, N, D = x.shape
    Dh = D // num_heads
    q, k, v, log_f, beta = _project(x, params)
    o = iva_recurrence(q, k, v, log_f, beta, num_heads=num_heads, chunk=chunk,
                       sub_block=sub_block, matmul_dtype=matmul_dtype)  # (B,N,D)
    # TODO(synk): module uses `rmsnorm_fused_gate` (num_groups=num_heads) applied
    # gate-less; implemented as per-head-group RMSNorm with a full-dim weight.
    og = o.reshape(B, N, num_heads, Dh)
    og = og * lax.rsqrt(jnp.mean(og * og, axis=-1, keepdims=True) + 1e-6)
    o = og.reshape(B, N, D) * params["norm_w"]
    return o @ params["Wo"].T


# ---------------------------------------------------------------------------
# Pure-JAX per-token reference for the recurrence (validation)
# ---------------------------------------------------------------------------
def _split_heads(t, num_heads):
    B, N, D = t.shape
    return t.reshape(B, N, num_heads, D // num_heads).transpose(0, 2, 1, 3)


def _ref_recurrence(q, k, v, log_f, beta, num_heads):
    q = _split_heads(q, num_heads)
    k = _split_heads(k, num_heads)
    v = _split_heads(v, num_heads)
    a = jnp.exp(log_f.astype(jnp.float32)).transpose(0, 2, 1)
    b = beta.astype(jnp.float32).transpose(0, 2, 1)

    q = jax.nn.silu(q)
    k = jax.nn.silu(k)
    k = k * lax.rsqrt(jnp.sum(k * k, axis=-1, keepdims=True) + 1e-12)

    def per_head(qh, kh, vh, ah, bh):
        d = qh.shape[-1]

        def step(s, inp):
            qt, kt, vt, at, bt = inp
            u = vt - at * (kt @ s)
            s = at * s + bt * jnp.outer(kt, u)
            return s, qt @ s

        _, o = lax.scan(step, jnp.zeros((d, d), jnp.float32), (qh, kh, vh, ah, bh))
        return o

    o = jax.vmap(jax.vmap(per_head))(q, k, v, a, b)           # (B,H,N,Dh)
    Bsz, H, N, Dh = o.shape
    return o.transpose(0, 2, 1, 3).reshape(Bsz, N, H * Dh)    # packed (B,N,D)


if __name__ == "__main__":
    def make_params(key, D, H):
        ks = jax.random.split(key, 6)

        def w(k_, shape):
            return (0.02 * jax.random.normal(k_, shape)).astype(jnp.float32)

        return {
            "Wq": w(ks[0], (D, D)), "Wk": w(ks[1], (D, D)),
            "Wv": w(ks[2], (D, D)), "Wo": w(ks[3], (D, D)),
            "Wf": w(ks[4], (H, D)), "Wbet": w(ks[5], (H, D)),
            "norm_w": jnp.ones((D,), jnp.float32),
        }

    def check(got, want, atol, rtol, name):
        if not jnp.allclose(got, want, atol=atol, rtol=rtol):
            err = float(jnp.max(jnp.abs(got - want)))
            raise AssertionError(f"{name}: mismatch vs JAX reference (max abs err {err})")

    key = jax.random.PRNGKey(0)
    k_par, k_x, k_par2, k_x2 = jax.random.split(key, 4)

    # --- primary config: head_dim=128 -> lane-packed path; exercises the
    #     multi-chunk state carry (N/C=2) and multi-sub-block solve (C/Bc=2) ---
    B, N, D, H = 2, 32, 256, 2
    CHUNK, SUB = 16, 8
    params = make_params(k_par, D, H)
    x = jax.random.normal(k_x, (B, N, D), dtype=jnp.float32)

    out = jax.block_until_ready(
        implicit_value_attention_forward(x, params, H, chunk=CHUNK, sub_block=SUB))
    assert out.shape == (B, N, D)

    q, k, v, log_f, beta = _project(x, params)
    want = _ref_recurrence(q, k, v, log_f, beta, H)

    got_f32 = jax.block_until_ready(
        iva_recurrence(q, k, v, log_f, beta, num_heads=H, chunk=CHUNK,
                       sub_block=SUB, matmul_dtype=jnp.float32))
    check(got_f32, want, 5e-3, 5e-3, "lane-packed f32")

    got_bf16 = jax.block_until_ready(
        iva_recurrence(q, k, v, log_f, beta, num_heads=H, chunk=CHUNK,
                       sub_block=SUB, matmul_dtype=jnp.bfloat16))
    check(got_bf16, want, 5e-2, 5e-2, "lane-packed bf16")

    # --- fallback config: head_dim=32 (< 128) -> head-split layout path ---
    B2, N2, D2, H2 = 2, 32, 64, 2
    params2 = make_params(k_par2, D2, H2)
    x2 = jax.random.normal(k_x2, (B2, N2, D2), dtype=jnp.float32)
    q2, k2, v2, lf2, bt2 = _project(x2, params2)
    got2 = jax.block_until_ready(
        iva_recurrence(q2, k2, v2, lf2, bt2, num_heads=H2, chunk=16,
                       sub_block=8, matmul_dtype=jnp.float32))
    check(got2, _ref_recurrence(q2, k2, v2, lf2, bt2, H2), 5e-3, 5e-3,
          "head-split f32")

    print("KERNEL_OK")
</pallas_src>

<mosaic_0001>
module attributes {stable_mosaic.version = 11 : i64} {
  func.func @_iva_chunk_kernel(%arg0: i32, %arg1: i32, %arg2: i32, %arg3: memref<1x1x16x2xf32, #tpu.memory_space<vmem>>, %arg4: memref<1x1x1x2x16xf32, #tpu.memory_space<vmem>>, %arg5: memref<1x16x128xf32, #tpu.memory_space<vmem>>, %arg6: memref<1x16x128xf32, #tpu.memory_space<vmem>>, %arg7: memref<1x16x128xf32, #tpu.memory_space<vmem>>, %arg8: memref<1x16x128xf32, #tpu.memory_space<vmem>>, %arg9: memref<128x128xf32, #tpu.memory_space<vmem>>) attributes {dimension_semantics = [#tpu.dimension_semantics<parallel>, #tpu.dimension_semantics<parallel>, #tpu.dimension_semantics<arbitrary>], iteration_bounds = array<i64: 2, 2, 2>, scalar_prefetch = 0 : i64, scratch_operands = 1 : i64, tpu.core_type = #tpu.core_type<tc>, window_params = [{transform_indices = @transform_0, window_bounds = array<i64: 1, 1, 16, 2>}, {transform_indices = @transform_1, window_bounds = array<i64: 1, 1, 1, 2, 16>}, {transform_indices = @transform_2, window_bounds = array<i64: 1, 16, 128>}, {transform_indices = @transform_3, window_bounds = array<i64: 1, 16, 128>}, {transform_indices = @transform_4, window_bounds = array<i64: 1, 16, 128>}, {transform_indices = @transform_5, window_bounds = array<i64: 1, 16, 128>}]} {
    %c0_i32 = arith.constant 0 : i32
    %0 = arith.cmpi eq, %arg2, %c0_i32 : i32
    %1 = arith.extui %0 : i1 to i32
    %c0_i32_0 = arith.constant 0 : i32
    %2 = arith.cmpi ne, %1, %c0_i32_0 : i32
    scf.if %2 {
      %cst_50 = arith.constant 0.000000e+00 : f32
      %153 = vector.broadcast %cst_50 : f32 to vector<128x128xf32>
      %c0_51 = arith.constant 0 : index
      %c0_52 = arith.constant 0 : index
      %154 = vector.load %arg9[%c0_51, %c0_52] : memref<128x128xf32, #tpu.memory_space<vmem>>, vector<128x128xf32>
      tpu.vector_store %arg9[%c0_51, %c0_52], %153 {strides = array<i32>} : memref<128x128xf32, #tpu.memory_space<vmem>>, vector<128x128xf32>,
    } else {
    }
    %c0 = arith.constant 0 : index
    %c0_1 = arith.constant 0 : index
    %c0_2 = arith.constant 0 : index
    %3 = vector.load %arg5[%c0, %c0_1, %c0_2] : memref<1x16x128xf32, #tpu.memory_space<vmem>>, vector<1x16x128xf32>
    %4 = vector.shape_cast %3 : vector<1x16x128xf32> to vector<16x128xf32>
    %5 = arith.negf %4 : vector<16x128xf32>
    %6 = math.exp %5 : vector<16x128xf32>
    %cst = arith.constant 1.000000e+00 : f32
    %7 = vector.broadcast %cst : f32 to vector<16x128xf32>
    %8 = arith.addf %7, %6 : vector<16x128xf32>
    %9 = arith.divf %7, %8 : vector<16x128xf32>
    %10 = arith.mulf %4, %9 : vector<16x128xf32>
    %c0_3 = arith.constant 0 : index
    %c0_4 = arith.constant 0 : index
    %c0_5 = arith.constant 0 : index
    %11 = vector.load %arg6[%c0_3, %c0_4, %c0_5] : memref<1x16x128xf32, #tpu.memory_space<vmem>>, vector<1x16x128xf32>
    %12 = vector.shape_cast %11 : vector<1x16x128xf32> to vector<16x128xf32>
    %13 = arith.negf %12 : vector<16x128xf32>
    %14 = math.exp %13 : vector<16x128xf32>
    %cst_6 = arith.constant 1.000000e+00 : f32
    %15 = vector.broadcast %cst_6 : f32 to vector<16x128xf32>
    %16 = arith.addf %15, %14 : vector<16x128xf32>
    %17 = arith.divf %15, %16 : vector<16x128xf32>
    %18 = arith.mulf %12, %17 : vector<16x128xf32>
    %19 = arith.mulf %18, %18 : vector<16x128xf32>
    %cst_7 = arith.constant dense<0.000000e+00> : vector<16xf32>
    %20 = vector.multi_reduction <add>, %19, %cst_7 [1] : vector<16x128xf32> to vector<16xf32>
    %21 = vector.shape_cast %20 : vector<16xf32> to vector<16x1xf32>
    %cst_8 = arith.constant 9.99999996E-13 : f32
    %22 = vector.broadcast %cst_8 : f32 to vector<16x1xf32>
    %23 = arith.addf %21, %22 : vector<16x1xf32>
    %24 = math.rsqrt %23 : vector<16x1xf32>
    %25 = vector.broadcast %24 : vector<16x1xf32> to vector<16x128xf32>
    %26 = arith.mulf %18, %25 : vector<16x128xf32>
    %c0_9 = arith.constant 0 : index
    %c0_10 = arith.constant 0 : index
    %c0_11 = arith.constant 0 : index
    %27 = vector.load %arg7[%c0_9, %c0_10, %c0_11] : memref<1x16x128xf32, #tpu.memory_space<vmem>>, vector<1x16x128xf32>
    %28 = vector.shape_cast %27 : vector<1x16x128xf32> to vector<16x128xf32>
    %c0_12 = arith.constant 0 : index
    %c0_13 = arith.constant 0 : index
    %c0_14 = arith.constant 0 : index
    %c0_15 = arith.constant 0 : index
    %29 = vector.load %arg3[%c0_12, %c0_13, %c0_14, %c0_15] : memref<1x1x16x2xf32, #tpu.memory_space<vmem>>, vector<1x1x16x2xf32>
    %30 = vector.shape_cast %29 : vector<1x1x16x2xf32> to vector<16x2xf32>
    %c0_16 = arith.constant 0 : index
    %c0_17 = arith.constant 0 : index
    %c0_18 = arith.constant 0 : index
    %c0_19 = arith.constant 0 : index
    %c0_20 = arith.constant 0 : index
    %31 = vector.load %arg4[%c0_16, %c0_17, %c0_18, %c0_19, %c0_20] : memref<1x1x1x2x16xf32, #tpu.memory_space<vmem>>, vector<1x1x1x2x16xf32>
    %32 = vector.shape_cast %31 : vector<1x1x1x2x16xf32> to vector<2x16xf32>
    %33 = vector.extract_strided_slice %30 {offsets = [0, 0], sizes = [16, 1], strides = [1, 1]} : vector<16x2xf32> to vector<16x1xf32>
    %34 = vector.extract_strided_slice %30 {offsets = [0, 1], sizes = [16, 1], strides = [1, 1]} : vector<16x2xf32> to vector<16x1xf32>
    %35 = vector.extract_strided_slice %32 {offsets = [0, 0], sizes = [1, 16], strides = [1, 1]} : vector<2x16xf32> to vector<1x16xf32>
    %36 = vector.extract_strided_slice %32 {offsets = [1, 0], sizes = [1, 16], strides = [1, 1]} : vector<2x16xf32> to vector<1x16xf32>
    %37 = math.exp %33 : vector<16x1xf32>
    %38 = tpu.iota {dimensions = array<i32: 0>} : vector<16x16xi32>
    %39 = tpu.iota {dimensions = array<i32: 1>} : vector<16x16xi32>
    %40 = arith.cmpi slt, %39, %38 : vector<16x16xi32>
    %41 = vector.broadcast %33 : vector<16x1xf32> to vector<16x16xf32>
    %42 = vector.broadcast %35 : vector<1x16xf32> to vector<16x16xf32>
    %43 = arith.subf %41, %42 : vector<16x16xf32>
    %cst_21 = arith.constant 0xFF800000 : f32
    %44 = vector.broadcast %cst_21 : f32 to vector<16x16xf32>
    %45 = arith.select %40, %43, %44 : vector<16x16xi1>, vector<16x16xf32>
    %46 = math.exp %45 : vector<16x16xf32>
    %47 = arith.truncf %26 : vector<16x128xf32> to vector<16x128xbf16>
    %48 = arith.truncf %26 : vector<16x128xf32> to vector<16x128xbf16>
    %cst_22 = arith.constant dense<0.000000e+00> : vector<16x16xf32>
    %49 = tpu.matmul %47, %48, %cst_22 {dimension_numbers = #tpu.dot_dimension_numbers<[1], [1], [0], [0], [0, 0, 1, 0], [], []>} : vector<16x128xbf16>, vector<16x128xbf16>, vector<16x16xf32> -> vector<16x16xf32>
    %50 = vector.broadcast %36 : vector<1x16xf32> to vector<16x16xf32>
    %51 = arith.mulf %46, %50 : vector<16x16xf32>
    %52 = arith.mulf %51, %49 : vector<16x16xf32>
    %c0_23 = arith.constant 0 : index
    %c0_24 = arith.constant 0 : index
    %53 = vector.load %arg9[%c0_23, %c0_24] : memref<128x128xf32, #tpu.memory_space<vmem>>, vector<128x128xf32>
    %54 = vector.broadcast %37 : vector<16x1xf32> to vector<16x128xf32>
    %55 = arith.mulf %54, %26 : vector<16x128xf32>
    %56 = arith.truncf %55 : vector<16x128xf32> to vector<16x128xbf16>
    %57 = arith.truncf %53 : vector<128x128xf32> to vector<128x128xbf16>
    %cst_25 = arith.constant dense<0.000000e+00> : vector<16x128xf32>
    %58 = tpu.matmul %56, %57, %cst_25 {dimension_numbers = #tpu.dot_dimension_numbers<[1], [0], [0], [1], [0, 0, 1, 1], [], []>} : vector<16x128xbf16>, vector<128x128xbf16>, vector<16x128xf32> -> vector<16x128xf32>
    %59 = arith.subf %28, %58 : vector<16x128xf32>
    %60 = vector.extract_strided_slice %59 {offsets = [0, 0], sizes = [8, 128], strides = [1, 1]} : vector<16x128xf32> to vector<8x128xf32>
    %61 = vector.extract_strided_slice %52 {offsets = [0, 0], sizes = [8, 8], strides = [1, 1]} : vector<16x16xf32> to vector<8x8xf32>
    %cst_26 = arith.constant 0.000000e+00 : f32
    %62 = vector.broadcast %cst_26 : f32 to vector<8x8xf32>
    %63 = arith.subf %62, %61 : vector<8x8xf32>
    %64 = arith.truncf %63 : vector<8x8xf32> to vector<8x8xbf16>
    %65 = arith.truncf %63 : vector<8x8xf32> to vector<8x8xbf16>
    %cst_27 = arith.constant dense<0.000000e+00> : vector<8x8xf32>
    %66 = tpu.matmul %64, %65, %cst_27 {dimension_numbers = #tpu.dot_dimension_numbers<[1], [0], [0], [1], [0, 0, 1, 1], [], []>} : vector<8x8xbf16>, vector<8x8xbf16>, vector<8x8xf32> -> vector<8x8xf32>
    %67 = arith.addf %63, %66 : vector<8x8xf32>
    %68 = arith.truncf %66 : vector<8x8xf32> to vector<8x8xbf16>
    %69 = arith.truncf %63 : vector<8x8xf32> to vector<8x8xbf16>
    %cst_28 = arith.constant dense<0.000000e+00> : vector<8x8xf32>
    %70 = tpu.matmul %68, %69, %cst_28 {dimension_numbers = #tpu.dot_dimension_numbers<[1], [0], [0], [1], [0, 0, 1, 1], [], []>} : vector<8x8xbf16>, vector<8x8xbf16>, vector<8x8xf32> -> vector<8x8xf32>
    %71 = arith.addf %67, %70 : vector<8x8xf32>
    %72 = arith.truncf %66 : vector<8x8xf32> to vector<8x8xbf16>
    %73 = arith.truncf %66 : vector<8x8xf32> to vector<8x8xbf16>
    %cst_29 = arith.constant dense<0.000000e+00> : vector<8x8xf32>
    %74 = tpu.matmul %72, %73, %cst_29 {dimension_numbers = #tpu.dot_dimension_numbers<[1], [0], [0], [1], [0, 0, 1, 1], [], []>} : vector<8x8xbf16>, vector<8x8xbf16>, vector<8x8xf32> -> vector<8x8xf32>
    %75 = arith.addf %71, %74 : vector<8x8xf32>
    %76 = arith.truncf %74 : vector<8x8xf32> to vector<8x8xbf16>
    %77 = arith.truncf %71 : vector<8x8xf32> to vector<8x8xbf16>
    %cst_30 = arith.constant dense<0.000000e+00> : vector<8x8xf32>
    %78 = tpu.matmul %76, %77, %cst_30 {dimension_numbers = #tpu.dot_dimension_numbers<[1], [0], [0], [1], [0, 0, 1, 1], [], []>} : vector<8x8xbf16>, vector<8x8xbf16>, vector<8x8xf32> -> vector<8x8xf32>
    %79 = arith.addf %75, %78 : vector<8x8xf32>
    %80 = arith.truncf %79 : vector<8x8xf32> to vector<8x8xbf16>
    %81 = arith.truncf %60 : vector<8x128xf32> to vector<8x128xbf16>
    %cst_31 = arith.constant dense<0.000000e+00> : vector<8x128xf32>
    %82 = tpu.matmul %80, %81, %cst_31 {dimension_numbers = #tpu.dot_dimension_numbers<[1], [0], [0], [1], [0, 0, 1, 1], [], []>} : vector<8x8xbf16>, vector<8x128xbf16>, vector<8x128xf32> -> vector<8x128xf32>
    %83 = arith.addf %60, %82 : vector<8x128xf32>
    %84 = vector.extract_strided_slice %59 {offsets = [8, 0], sizes = [8, 128], strides = [1, 1]} : vector<16x128xf32> to vector<8x128xf32>
    %85 = vector.extract_strided_slice %52 {offsets = [8, 0], sizes = [8, 8], strides = [1, 1]} : vector<16x16xf32> to vector<8x8xf32>
    %86 = arith.truncf %85 : vector<8x8xf32> to vector<8x8xbf16>
    %87 = arith.truncf %83 : vector<8x128xf32> to vector<8x128xbf16>
    %cst_32 = arith.constant dense<0.000000e+00> : vector<8x128xf32>
    %88 = tpu.matmul %86, %87, %cst_32 {dimension_numbers = #tpu.dot_dimension_numbers<[1], [0], [0], [1], [0, 0, 1, 1], [], []>} : vector<8x8xbf16>, vector<8x128xbf16>, vector<8x128xf32> -> vector<8x128xf32>
    %89 = arith.subf %84, %88 : vector<8x128xf32>
    %90 = vector.extract_strided_slice %52 {offsets = [8, 8], sizes = [8, 8], strides = [1, 1]} : vector<16x16xf32> to vector<8x8xf32>
    %cst_33 = arith.constant 0.000000e+00 : f32
    %91 = vector.broadcast %cst_33 : f32 to vector<8x8xf32>
    %92 = arith.subf %91, %90 : vector<8x8xf32>
    %93 = arith.truncf %92 : vector<8x8xf32> to vector<8x8xbf16>
    %94 = arith.truncf %92 : vector<8x8xf32> to vector<8x8xbf16>
    %cst_34 = arith.constant dense<0.000000e+00> : vector<8x8xf32>
    %95 = tpu.matmul %93, %94, %cst_34 {dimension_numbers = #tpu.dot_dimension_numbers<[1], [0], [0], [1], [0, 0, 1, 1], [], []>} : vector<8x8xbf16>, vector<8x8xbf16>, vector<8x8xf32> -> vector<8x8xf32>
    %96 = arith.addf %92, %95 : vector<8x8xf32>
    %97 = arith.truncf %95 : vector<8x8xf32> to vector<8x8xbf16>
    %98 = arith.truncf %92 : vector<8x8xf32> to vector<8x8xbf16>
    %cst_35 = arith.constant dense<0.000000e+00> : vector<8x8xf32>
    %99 = tpu.matmul %97, %98, %cst_35 {dimension_numbers = #tpu.dot_dimension_numbers<[1], [0], [0], [1], [0, 0, 1, 1], [], []>} : vector<8x8xbf16>, vector<8x8xbf16>, vector<8x8xf32> -> vector<8x8xf32>
    %100 = arith.addf %96, %99 : vector<8x8xf32>
    %101 = arith.truncf %95 : vector<8x8xf32> to vector<8x8xbf16>
    %102 = arith.truncf %95 : vector<8x8xf32> to vector<8x8xbf16>
    %cst_36 = arith.constant dense<0.000000e+00> : vector<8x8xf32>
    %103 = tpu.matmul %101, %102, %cst_36 {dimension_numbers = #tpu.dot_dimension_numbers<[1], [0], [0], [1], [0, 0, 1, 1], [], []>} : vector<8x8xbf16>, vector<8x8xbf16>, vector<8x8xf32> -> vector<8x8xf32>
    %104 = arith.addf %100, %103 : vector<8x8xf32>
    %105 = arith.truncf %103 : vector<8x8xf32> to vector<8x8xbf16>
    %106 = arith.truncf %100 : vector<8x8xf32> to vector<8x8xbf16>
    %cst_37 = arith.constant dense<0.000000e+00> : vector<8x8xf32>
    %107 = tpu.matmul %105, %106, %cst_37 {dimension_numbers = #tpu.dot_dimension_numbers<[1], [0], [0], [1], [0, 0, 1, 1], [], []>} : vector<8x8xbf16>, vector<8x8xbf16>, vector<8x8xf32> -> vector<8x8xf32>
    %108 = arith.addf %104, %107 : vector<8x8xf32>
    %109 = arith.truncf %108 : vector<8x8xf32> to vector<8x8xbf16>
    %110 = arith.truncf %89 : vector<8x128xf32> to vector<8x128xbf16>
    %cst_38 = arith.constant dense<0.000000e+00> : vector<8x128xf32>
    %111 = tpu.matmul %109, %110, %cst_38 {dimension_numbers = #tpu.dot_dimension_numbers<[1], [0], [0], [1], [0, 0, 1, 1], [], []>} : vector<8x8xbf16>, vector<8x128xbf16>, vector<8x128xf32> -> vector<8x128xf32>
    %112 = arith.addf %89, %111 : vector<8x128xf32>
    %113 = tpu.concatenate %83, %112 in 0 : vector<8x128xf32>, vector<8x128xf32> -> vector<16x128xf32>
    %114 = arith.cmpi eq, %38, %39 : vector<16x16xi32>
    %cst_39 = arith.constant 1.000000e+00 : f32
    %cst_40 = arith.constant 0.000000e+00 : f32
    %115 = vector.broadcast %cst_39 : f32 to vector<16x16xf32>
    %116 = vector.broadcast %cst_40 : f32 to vector<16x16xf32>
    %117 = arith.select %114, %115, %116 : vector<16x16xi1>, vector<16x16xf32>
    %118 = arith.addf %46, %117 : vector<16x16xf32>
    %119 = vector.broadcast %36 : vector<1x16xf32> to vector<16x16xf32>
    %120 = arith.mulf %118, %119 : vector<16x16xf32>
    %121 = arith.truncf %10 : vector<16x128xf32> to vector<16x128xbf16>
    %122 = arith.truncf %26 : vector<16x128xf32> to vector<16x128xbf16>
    %cst_41 = arith.constant dense<0.000000e+00> : vector<16x16xf32>
    %123 = tpu.matmul %121, %122, %cst_41 {dimension_numbers = #tpu.dot_dimension_numbers<[1], [1], [0], [0], [0, 0, 1, 0], [], []>} : vector<16x128xbf16>, vector<16x128xbf16>, vector<16x16xf32> -> vector<16x16xf32>
    %124 = arith.mulf %120, %123 : vector<16x16xf32>
    %125 = vector.broadcast %37 : vector<16x1xf32> to vector<16x128xf32>
    %126 = arith.mulf %125, %10 : vector<16x128xf32>
    %127 = arith.truncf %126 : vector<16x128xf32> to vector<16x128xbf16>
    %128 = arith.truncf %53 : vector<128x128xf32> to vector<128x128xbf16>
    %cst_42 = arith.constant dense<0.000000e+00> : vector<16x128xf32>
    %129 = tpu.matmul %127, %128, %cst_42 {dimension_numbers = #tpu.dot_dimension_numbers<[1], [0], [0], [1], [0, 0, 1, 1], [], []>} : vector<16x128xbf16>, vector<128x128xbf16>, vector<16x128xf32> -> vector<16x128xf32>
    %130 = arith.truncf %124 : vector<16x16xf32> to vector<16x16xbf16>
    %131 = arith.truncf %113 : vector<16x128xf32> to vector<16x128xbf16>
    %cst_43 = arith.constant dense<0.000000e+00> : vector<16x128xf32>
    %132 = tpu.matmul %130, %131, %cst_43 {dimension_numbers = #tpu.dot_dimension_numbers<[1], [0], [0], [1], [0, 0, 1, 1], [], []>} : vector<16x16xbf16>, vector<16x128xbf16>, vector<16x128xf32> -> vector<16x128xf32>
    %133 = arith.addf %129, %132 : vector<16x128xf32>
    %c0_44 = arith.constant 0 : index
    %c0_45 = arith.constant 0 : index
    %c0_46 = arith.constant 0 : index
    %134 = vector.load %arg8[%c0_44, %c0_45, %c0_46] : memref<1x16x128xf32, #tpu.memory_space<vmem>>, vector<1x16x128xf32>
    %135 = vector.shape_cast %134 : vector<1x16x128xf32> to vector<16x128xf32>
    %136 = vector.shape_cast %133 : vector<16x128xf32> to vector<1x16x128xf32>
    tpu.vector_store %arg8[%c0_44, %c0_45, %c0_46], %136 {strides = array<i32>} : memref<1x16x128xf32, #tpu.memory_space<vmem>>, vector<1x16x128xf32>,
    %137 = vector.extract_strided_slice %33 {offsets = [15, 0], sizes = [1, 1], strides = [1, 1]} : vector<16x1xf32> to vector<1x1xf32>
    %138 = vector.extract %137[0, 0] : f32 from vector<1x1xf32>
    %139 = vector.broadcast %138 : f32 to vector<16x1xf32>
    %140 = arith.subf %139, %33 : vector<16x1xf32>
    %141 = math.exp %140 : vector<16x1xf32>
    %142 = arith.mulf %141, %34 : vector<16x1xf32>
    %143 = vector.broadcast %142 : vector<16x1xf32> to vector<16x128xf32>
    %144 = arith.mulf %143, %26 : vector<16x128xf32>
    %145 = math.exp %138 : f32
    %146 = vector.broadcast %145 : f32 to vector<128x128xf32>
    %147 = arith.mulf %146, %53 : vector<128x128xf32>
    %148 = arith.truncf %144 : vector<16x128xf32> to vector<16x128xbf16>
    %149 = arith.truncf %113 : vector<16x128xf32> to vector<16x128xbf16>
    %cst_47 = arith.constant dense<0.000000e+00> : vector<128x128xf32>
    %150 = tpu.matmul %148, %149, %cst_47 {dimension_numbers = #tpu.dot_dimension_numbers<[0], [0], [1], [1], [0, 1, 1, 1], [], []>} : vector<16x128xbf16>, vector<16x128xbf16>, vector<128x128xf32> -> vector<128x128xf32>
    %151 = arith.addf %147, %150 : vector<128x128xf32>
    %c0_48 = arith.constant 0 : index
    %c0_49 = arith.constant 0 : index
    %152 = vector.load %arg9[%c0_48, %c0_49] : memref<128x128xf32, #tpu.memory_space<vmem>>, vector<128x128xf32>
    tpu.vector_store %arg9[%c0_48, %c0_49], %151 {strides = array<i32>} : memref<128x128xf32, #tpu.memory_space<vmem>>, vector<128x128xf32>,
    return
  }
  func.func @transform_0(%arg0: i32, %arg1: i32, %arg2: i32) -> (i32, i32, i32, i32) {
    %c0_i32 = arith.constant 0 : i32
    %c0_i32_0 = arith.constant 0 : i32
    return %arg0, %arg1, %arg2, %c0_i32 : i32, i32, i32, i32
  }
  func.func @transform_1(%arg0: i32, %arg1: i32, %arg2: i32) -> (i32, i32, i32, i32, i32) {
    %c0_i32 = arith.constant 0 : i32
    %c0_i32_0 = arith.constant 0 : i32
    %c0_i32_1 = arith.constant 0 : i32
    return %arg0, %arg1, %arg2, %c0_i32, %c0_i32_0 : i32, i32, i32, i32, i32
  }
  func.func @transform_2(%arg0: i32, %arg1: i32, %arg2: i32) -> (i32, i32, i32) {
    %c0_i32 = arith.constant 0 : i32
    return %arg0, %arg2, %arg1 : i32, i32, i32
  }
  func.func @transform_3(%arg0: i32, %arg1: i32, %arg2: i32) -> (i32, i32, i32) {
    %c0_i32 = arith.constant 0 : i32
    return %arg0, %arg2, %arg1 : i32, i32, i32
  }
  func.func @transform_4(%arg0: i32, %arg1: i32, %arg2: i32) -> (i32, i32, i32) {
    %c0_i32 = arith.constant 0 : i32
    return %arg0, %arg2, %arg1 : i32, i32, i32
  }
  func.func @transform_5(%arg0: i32, %arg1: i32, %arg2: i32) -> (i32, i32, i32) {
    %c0_i32 = arith.constant 0 : i32
    return %arg0, %arg2, %arg1 : i32, i32, i32
  }
}

</mosaic_0001>

<bundles_post_ra>
// kernel: tpu_custom_call.1
= control target key start
LH: loop header
LB: loop body
LE: loop exit
PB: predicated region body
PF: predicated region fallthrough
CT: control target
= control target key end

     0   :  { %s3157_s0 = inlined_call_operand.vmem [shape: f32[2,2,32,2], index: 0, kind: input, shape index: {}]   ;;  %s3158_s1 = inlined_call_operand.hbm [shape: f32[2,2,2,2,16], index: 1, kind: input, shape index: {}]   ;;  %s3159_s2 = inlined_call_operand.vmem [shape: f32[2,32,256], index: 2, kind: input, shape index: {}]   ;;  %s3160_s3 = inlined_call_operand.hbm [shape: f32[2,32,256], index: 3, kind: input, shape index: {}]   ;;  %s3161_s4 = inlined_call_operand.hbm [shape: f32[2,32,256], index: 4, kind: input, shape index: {}]   ;;  %s3162_s5 = inlined_call_operand.hbm [shape: f32[2,32,256], index: 5, kind: output, shape index: {}]  }
   0x1   :  { %3178 = sst [smem:[#allocation27_spill]] %s3157_s0 }
   0x2   :  { %3179 = sst [smem:[#allocation28_spill]] %s3162_s5 }
   0x3   :  { %10 = vsyncpa [#allocation4], 0 }
   0x4   :  { %12 = vsyncpa [#allocation4 + $0x1], 0 }
   0x5   :  { %13 = vsyncpa [#allocation8], 0 }
   0x6   :  { %15 = vsyncpa [#allocation8 + $0x1], 0 }
   0x7   :  { %16 = vsyncpa [#allocation5], 0 }
   0x8   :  { %18 = vsyncpa [#allocation5 + $0x1], 0  ;;  %s2542_s18 = smov 0   ;;  %s2544_s19 = smov 0  }
   0x9   :  { %s2546_s20 = smov 0   ;;  %s2548_s21 = smov 0  }
   0xa   :  { %s2550_s22 = smov 0   ;;  %s2552_s23 = smov 0  }
   0xb   :  { %s2554_s24 = smov 0   ;;  %s2556_s25 = smov 0  }
   0xc   :  { %s2558_s26 = smov 0   ;;  %s2560_s27 = smov 0  }
   0xd   :  { %s2562_s28 = smov 0   ;;  %s2564_s29 = smov 0  }
   0xe   :  { %s2566_s30 = smov 0  }
   0xf LB: > { %3180 = sst [smem:[#allocation14_spill]] %s2446_s18  ;;  %s2608_s6 = sadd.s32 4294967295, %s2494_s30   ;;  %s2494_s30 = sphi %s2566_s30, %s24_s30   ;;  %s2490_s29 = sphi %s2564_s29, %s3232_s29   ;;  %s2486_s28 = sphi %s2562_s28, %s3231_s28   ;;  %s2482_s27 = sphi %s2560_s27, %s3230_s27   ;;  %s2478_s26 = sphi %s2558_s26, %s3229_s26   ;;  %s2474_s25 = sphi %s2556_s25, %s3228_s25   ;;  %s2470_s24 = sphi %s2554_s24, %s3227_s24   ;;  %s2466_s23 = sphi %s2552_s23, %s3218_s23   ;;  %s2462_s22 = sphi %s2550_s22, %s3226_s22   ;;  %s2458_s21 = sphi %s2548_s21, %s3225_s21   ;;  %s2454_s20 = sphi %s2546_s20, %s3224_s20   ;;  %s2450_s19 = sphi %s2544_s19, %s3223_s19   ;;  %s2446_s18 = sphi %s2542_s18, %s3222_s18  }
  0x10   : > { %3181 = sst [smem:[#allocation15_spill]] %s2466_s23  ;;  %s36_s8 = sadd.s32 1, %s2482_s27 }
  0x11   : > { %3182 = sst [smem:[#allocation16_spill]] %s2470_s24  ;;  %s39_s9 = sadd.s32 1, %s2486_s28 }
  0x12   : > { %3183 = sst [smem:[#allocation17_spill]] %s2474_s25  ;;  %p37_p0 = scmp.ge.s32.totalorder %s36_s8, 2 }
  0x13   : > { %3184 = sst [smem:[#allocation18_spill]] %s2478_s26  ;;  %s43_s10 = sadd.s32 1, %s2490_s29 }
  0x14   : > { %p91_p1 = scmp.ne.s32.totalorder %s2466_s23, %s2462_s22  ;;  %s3234_s8 = smov (%p37_p0, %s36_s8), 0 }
  0x15   : > { %3185 = sst [smem:[#allocation19_spill]] %s3234_s8  ;;  %s3236_s9 = smov (!%p37_p0, %s39_s9), %s2486_s28 }
  0x16   : > { %s80_s12 = ssub.s32 %s2482_s27, %s3234_s8  ;;  %p92_p2 = scmp.eq.s32.totalorder %s2494_s30, 0 }
  0x17   : > { %p41_p3 = scmp.ge.s32.totalorder %s3236_s9, 2  ;;  %p97_p4 = scmp.ne.s32.totalorder %s2462_s22, %s2458_s21 }
  0x18   : > { %p2627_p5 = por %p92_p2, %p91_p1  ;;  %p98_p6 = scmp.eq.s32.totalorder %s2608_s6, 0 }
  0x19   : > { %s3238_s9 = smov (%p41_p3, %s3236_s9), 0  ;;  %s3240_s10 = smov (!%p41_p3, %s43_s10), %s2490_s29 }
  0x1a   : > { %3187 = sst [smem:[#allocation20_spill]] %s3238_s9  ;;  %s78_s14 = ssub.s32 %s2486_s28, %s3238_s9 }
  0x1b   : > { %p2637_p7 = por %p98_p6, %p97_p4  ;;  %p45_p8 = scmp.ge.s32.totalorder %s3240_s10, 2 }
  0x1c   : > { %s114_s16 = sadd.s32 1, %s2454_s20  ;;  %p121_p9 = scmp.ne.s32.totalorder %s2454_s20, %s2450_s19 }
  0x1d   : > { %s3188_s15 = scalar_select %p2637_p7, 1, 0 }
  0x1e   : > { %p157_p10 = scmp.ne.s32.totalorder %s2450_s19, %s2446_s18  ;;  %s3242_s10 = smov (%p45_p8, %s3240_s10), 0 }
  0x1f   : > { %3189 = sst [smem:[#allocation21_spill]] %s3188_s15  ;;  %p2653_p11 = por %p121_p9, %p92_p2 }
  0x20   : > { %3190 = sst [smem:[#allocation22_spill]] %s3242_s10  ;;  %p2660_p12 = por %p157_p10, %p98_p6 }
  0x21   : > { %s77_s11 = ssub.s32 %s2490_s29, %s3242_s10  ;;  %p215_p13 = scmp.eq.s32.totalorder %s2608_s6, 7 }
  0x22   : > { %s79_s7 = sor.u32 %s78_s14, %s77_s11  ;;  %s109_s9 = sor.u32 %s80_s12, %s77_s11 }
  0x23   : > { %s81_s8 = sor.u32 %s80_s12, %s79_s7  ;;  %s111_s5 = sor.u32 %s109_s9, %s78_s14 }
  0x24   : > { %p82_p0 = scmp.eq.s32.totalorder %s81_s8, 0  ;;  %p112_p1 = scmp.eq.s32.totalorder %s111_s5, 0 }
  0x25   : > { %p2670_p3 = por %p215_p13, %p121_p9  ;;  %s3195_s25 = sadd.s32 4294967294, %s2494_s30  }
  0x26   : > { %p221_p2 = scmp.eq.s32.totalorder %s3195_s25, 7  ;;  %s3196_s26 = sadd.s32 1, %s2466_s23 }
  0x27   : > { %s3193_s0 = scalar_select %p2670_p3, 1, 0 }
  0x28   : > { %s2679_s24 = scalar_select %p82_p0, %s2466_s23, %s3196_s26  }
  0x29   : > { %3194 = sst [smem:[#allocation23_spill]] %s3193_s0  ;;  %p2687_p4 = por %p221_p2, %p157_p10 }
  0x2a   : > { %3197 = sst [smem:[#allocation24_spill]] %s2679_s24  ;;  %p1844_p6 = scmp.ge.s32.totalorder %s2494_s30, 8 }
  0x2b   : > { %s2682_s15 = scalar_select %p112_p1, %s2454_s20, %s114_s16  }
  0x2c   : > { %s3199_s10 = scalar_select %p2687_p4, 1, 0 }
  0x2d   : > { %3198 = sst [smem:[#allocation25_spill]] %s2682_s15  ;;  %237 = sbr.rel (%p1844_p6) target bundleno = 103 (0x67), region = 16 }
  0x2e   : > { %3200 = sst [smem:[#allocation26_spill]] %s3199_s10  ;;  %s258_s5 = sand.u32 (!%p1844_p6), 1, %s2466_s23  }
  0x2f   : > { %s1846_s25 = sshll.u32 (!%p1844_p6), %s2486_s28, 1  ;;  %s1845_s7 = sshll.u32 (!%p1844_p6), %s258_s5, 1 }
  0x30   : > { %s267_s26 = sadd.s32 (!%p1844_p6), %s2482_s27, %s1846_s25  ;;  %s1847_s8 = sshll.u32 (!%p1844_p6), %s2490_s29, 2 }
  0x31   : > { %s262_s9 = scalar_lea.vmem (!%p1844_p6), [#allocation3], %s1845_s7  ;;  %s269_s12 = sadd.s32 (!%p1844_p6), %s1847_s8, %s267_s26 }
  0x32   : > { %s273_s11 = sshll.u32 %s262_s9, 4  ;;  %s1848_s14 = sshll.u32 %s269_s12, 5  ;;  %s274_s11 = int_to_ptr.vmem [resolvable:$true] %s273_s11 }
  0x33   : > { %s271_s15 = scalar_lea.hbm %s3158_s1, %s1848_s14  ;;  %s259_s10 = scalar_lea.sflag [#allocation4], %s258_s5 }
  0x34   : > { %s2288_s18 = scalar_lea.vmem %s274_s11, 32  ;;  %s2496_s23 = smov [#allocation3]  }
  0x35   : > { %p2289_p8 = scmp.ne.s32.totalorder %s274_s11, %s2288_s18  ;;  %s2292_s0 = sshll.u32 %s2496_s23, 4  ;;  %s2293_s0 = int_to_ptr.vmem [resolvable:$false] %s2292_s0 }
  0x36   : > { %s2294_s25 = scalar_lea.vmem %s2293_s0, 64  ;;  %p2295_p13 = scmp.lt.s32.totalorder %s274_s11, %s2293_s0 }
  0x37   : > { %p2290_p9 = pnand %p2289_p8, %p2627_p5  ;;  %p2296_p0 = scmp.lt.s32.totalorder %s2294_s25, %s2288_s18 }
  0x39   : > { %p2291_p10 = pneg %p2290_p9  ;;  %p2297_p1 = por %p2296_p0, %p2295_p13 }
  0x3b   : > { %p2298_p2 = pnand %p2297_p1, %p2291_p10 }
  0x3d   : > { %2301 = shalt.err (!%p2298_p2)
}
  0x3e   : > { %2111 = dma.hbm_to_vmem [thread:$0]  (%p2627_p5), %s271_s15, 32, %s274_s11, %s259_s10  }
  0x3f   : > { %279 = sbr.rel (!%p2653_p11) target bundleno = 71 (0x47), region = 28  ;;  %s281_s24 = sand.u32 (%p2653_p11), 1, %s2454_s20  }
  0x40   : > { %s1906_s5 = sshll.u32 (%p2653_p11), %s2482_s27, 2  ;;  %s1849_s23 = sshll.u32 (%p2653_p11), %s281_s24, 4 }
  0x41   : > { %s286_s7 = sadd.s32 (%p2653_p11), %s2486_s28, %s1906_s5  ;;  %s1852_s26 = sshll.u32 (%p2653_p11), %s2490_s29, 3 }
  0x42   : > { %s288_s0 = sadd.s32 (%p2653_p11), %s1852_s26, %s286_s7  ;;  %s283_s10 = scalar_lea.vmem (%p2653_p11), [#allocation6], %s1849_s23 }
  0x43   : > { %s1853_s18 = sshll.u32 (%p2653_p11), %s288_s0, 3 }
  0x44   : > { %s290_s12 = scalar_lea.vmem %s3159_s2, %s1853_s18 }
  0x45   : > { %v321_v0 = vld [vmem:[%s290_s12] sm:$0xff]  ;;  %v323_v1 = vld [vmem:[%s290_s12 + $0x10] sm:$0xff] }
  0x46   : > { %322 = vst [vmem:[%s283_s10] sm:$0xff] %v321_v0  ;;  %324 = vst [vmem:[%s283_s10 + $0x8] sm:$0xff] %v323_v1 }
  0x47 PF: > { %s331_s13 = sand.u32 1, %s2494_s30   ;;  %s333_s15 = sand.u32 1, %s2454_s20  }
  0x48   : > { %s2714_s11 = sshll.u32 %s333_s15, 4  ;;  %s1907_s14 = sshll.u32 %s2482_s27, 2 }
  0x49   : > { %s341_s16 = sadd.s32 %s2486_s28, %s1907_s14  ;;  %s1857_s25 = sshll.u32 %s2490_s29, 3 }
  0x4a   : > { %s343_s24 = sadd.s32 %s1857_s25, %s341_s16  ;;  %s335_s5 = scalar_lea.vmem [#allocation7], %s2714_s11 }
  0x4b   : > { %s346_s23 = sshll.u32 %s335_s5, 4  ;;  %s1858_s7 = sshll.u32 %s343_s24, 7  ;;  %s347_s23 = int_to_ptr.vmem [resolvable:$true] %s346_s23 }
  0x4c   : > { %s345_s18 = scalar_lea.hbm %s3160_s3, %s1858_s7  ;;  %s2723_s8 = scalar_lea.sflag [#allocation8], %s331_s13 }
  0x4d   : > { %s2314_s9 = scalar_lea.vmem %s347_s23, 256  ;;  %s2497_s12 = smov [#allocation7]  }
  0x4e   : > { %p2315_p5 = scmp.ne.s32.totalorder %s347_s23, %s2314_s9  ;;  %s2318_s10 = sshll.u32 %s2497_s12, 4  ;;  %s2319_s10 = int_to_ptr.vmem [resolvable:$false] %s2318_s10 }
  0x4f   : > { %s2320_s15 = scalar_lea.vmem %s2319_s10, 512  ;;  %p2321_p9 = scmp.lt.s32.totalorder %s347_s23, %s2319_s10 }
  0x50   : > { %p2316_p6 = pnand %p2315_p5, %p2653_p11  ;;  %p2322_p10 = scmp.lt.s32.totalorder %s2320_s15, %s2314_s9 }
  0x52   : > { %p2317_p8 = pneg %p2316_p6  ;;  %p2323_p13 = por %p2322_p10, %p2321_p9 }
  0x54   : > { %p2324_p0 = pnand %p2323_p13, %p2317_p8 }
  0x56   : > { %2327 = shalt.err (!%p2324_p0)
}
  0x57   : > { %s2498_s14 = smov 256   ;;  %s2499_s13 = smov 128  }
  0x58   : > { %s2500_s16 = smov 8   ;;  %s370_s5 = scalar_lea.hbm %s3161_s4, %s1858_s7 }
  0x59   : > { %2112 = dma.hbm_to_vmem [thread:$0]  (%p2653_p11), %s345_s18, 256, %s347_s23, %s2723_s8, %s2498_s14, %s2499_s13, %s2500_s16  }
  0x5a   : > { %s360_s26 = scalar_lea.vmem [#allocation9], %s2714_s11  ;;  %s2501_s12 = smov [#allocation9]  }
  0x5b   : > { %s371_s0 = sshll.u32 %s360_s26, 4  ;;  %s2344_s10 = sshll.u32 %s2501_s12, 4  ;;  %s372_s0 = int_to_ptr.vmem [resolvable:$true] %s371_s0  ;;  %s2345_s10 = int_to_ptr.vmem [resolvable:$false] %s2344_s10 }
  0x5c   : > { %s2340_s9 = scalar_lea.vmem %s372_s0, 256  ;;  %s2346_s15 = scalar_lea.vmem %s2345_s10, 512 }
  0x5d   : > { %p2341_p1 = scmp.ne.s32.totalorder %s372_s0, %s2340_s9  ;;  %p2347_p6 = scmp.lt.s32.totalorder %s372_s0, %s2345_s10 }
  0x5e   : > { %p2348_p8 = scmp.lt.s32.totalorder %s2346_s15, %s2340_s9 }
  0x5f   : > { %p2342_p2 = pnand %p2341_p1, %p2653_p11 }
  0x60   : > { %p2349_p9 = por %p2348_p8, %p2347_p6 }
  0x61   : > { %p2343_p5 = pneg %p2342_p2 }
  0x63   : > { %p2350_p10 = pnand %p2349_p9, %p2343_p5 }
  0x65   : > { %2353 = shalt.err (!%p2350_p10)
}
  0x66   : > { %2113 = dma.hbm_to_vmem [thread:$0]  (%p2653_p11), %s370_s5, 256, %s372_s0, %s2723_s8, %s2498_s14, %s2499_s13, %s2500_s16  }
  0x67 PF: > { %p1864_p13 = scmp.ge.s32.totalorder %s2494_s30, 1  ;;  %p379_p0 = scmp.lt.s32.totalorder %s2494_s30, 9 }
  0x69   : > { %p380_p1 = pnand %p1864_p13, %p379_p0 }
  0x6a   : > { %s385_s23 = sand.u32 (!%p380_p1), 1, %s2462_s22  }
  0x6b   : > { %383 = sbr.rel (%p380_p1) target bundleno = 2680 (0xa78), region = 74  ;;  %s2742_s7 = sshll.u32 (!%p380_p1), %s385_s23, 1 }
  0x6c   : > { %s386_s18 = scalar_lea.sflag (!%p380_p1), [#allocation4], %s385_s23  ;;  %s389_s25 = scalar_lea.vmem (!%p380_p1), [#allocation3], %s2742_s7 }
  0x70   : > { %2433 = dma.done.wait (%p2637_p7), %s386_s18, 32  }
  0x71   : > { %2435 = vsyncadd (%p2637_p7), %s386_s18, 4294967264  ;;  %s3177_s17 = sand.u32 1, %s2450_s19   ;;  %s401_s8 = sand.u32 1, %s2608_s6  }
  0x72   : > { %s2753_s14 = sshll.u32 %s3177_s17, 4  ;;  %s402_s16 = scalar_lea.sflag [#allocation8], %s401_s8 }
  0x73   : > { %s397_s13 = scalar_lea.vmem [#allocation6], %s2753_s14  ;;  %s405_s24 = scalar_lea.vmem [#allocation7], %s2753_s14 }
  0x74   : > { %2437 = dma.done.wait (%p2660_p12), %s402_s16, 512  }
  0x75   : > { %2439 = vsyncadd (%p2660_p12), %s402_s16, 4294966784  ;;  %s3202_s5 = sld [smem:[#allocation16_spill]]  ;;  %s414_s16 = scalar_lea.vmem [#allocation9], %s2753_s14 }
  0x76   : > { %s3203_s26 = sld [smem:[#allocation18_spill]]  ;;  %s2773_s17 = scalar_lea.vmem [#allocation10], %s2753_s14 }
  0x77   : > { %s3204_s0 = sld [smem:[#allocation17_spill]] }
  0x78   : > { %s3205_s18 = sld [smem:[#allocation27_spill]] }
  0x7b   : > { %s1870_s6 = sshll.u32 %s3202_s5, 1  ;;  %p1874_p12 = scmp.ne.s32.totalorder %s3202_s5, 0 }
  0x7c   : > { %p469_p7 = scmp.lt.s32.totalorder %s3203_s26, 1  ;;  %p473_p2 = scmp.lt.s32.totalorder %s1870_s6, 3 }
  0x7d   : > { %p471_p11 = scmp.lt.s32.totalorder %s3204_s0, 1 }
  0x7e   : > { %s3244_s26 = smov (!%p469_p7, %s3203_s26), 1  ;;  %s3248_s6 = smov (!%p473_p2, %s1870_s6), 3 }
  0x7f   : > { %s3246_s0 = smov (!%p471_p11, %s3204_s0), 1  ;;  %s1872_s12 = sshll.u32 %s3244_s26, 3 }
  0x80   : > { %s1871_s9 = sshll.u32 %s3246_s0, 2  ;;  %490 = sbr.rel (%p1874_p12) target bundleno = 142 (0x8e), region = 94 }
  0x81   : > { %s476_s10 = sadd.s32 %s1871_s9, %s3248_s6 }
  0x82   : > { %s478_s15 = sadd.s32 %s1872_s12, %s476_s10 }
  0x83   : > { %s1873_s21 = sshll.u32 %s478_s15, 3 }
  0x84   : > { %s2769_s8 = scalar_lea.vmem %s3205_s18, %s1873_s21 }
  0x85   : > { %v2502_v2 = vmov 0.0  }
  0x86   : > { %491 = vst [vmem:[#allocation2 + $0x30] sm:$0xff] %v2502_v2  ;;  %492 = vst [vmem:[#allocation2] sm:$0xff] %v2502_v2 }
  0x87   : > { %493 = vst [vmem:[#allocation2 + $0x58] sm:$0xff] %v2502_v2  ;;  %494 = vst [vmem:[#allocation2 + $0x18] sm:$0xff] %v2502_v2 }
  0x88   : > { %495 = vst [vmem:[#allocation2 + $0x50] sm:$0xff] %v2502_v2  ;;  %496 = vst [vmem:[#allocation2 + $0x68] sm:$0xff] %v2502_v2 }
  0x89   : > { %497 = vst [vmem:[#allocation2 + $0x8] sm:$0xff] %v2502_v2  ;;  %498 = vst [vmem:[#allocation2 + $0x48] sm:$0xff] %v2502_v2 }
  0x8a   : > { %499 = vst [vmem:[#allocation2 + $0x40] sm:$0xff] %v2502_v2  ;;  %500 = vst [vmem:[#allocation2 + $0x20] sm:$0xff] %v2502_v2 }
  0x8b   : > { %501 = vst [vmem:[#allocation2 + $0x10] sm:$0xff] %v2502_v2  ;;  %502 = vst [vmem:[#allocation2 + $0x38] sm:$0xff] %v2502_v2 }
  0x8c   : > { %503 = vst [vmem:[#allocation2 + $0x60] sm:$0xff] %v2502_v2  ;;  %504 = vst [vmem:[#allocation2 + $0x70] sm:$0xff] %v2502_v2 }
  0x8d   : > { %505 = vst [vmem:[#allocation2 + $0x78] sm:$0xff] %v2502_v2  ;;  %506 = vst [vmem:[#allocation2 + $0x28] sm:$0xff] %v2502_v2 }
  0x8e PF: > { %v523_v3 = vld [vmem:[%s405_s24] sm:$0xff]  ;;  %v524_v4 = vld [vmem:[%s405_s24 + $0x8] sm:$0xff]  ;;  %v2503_v8 = vmov 0   ;;  %v2504_v10 = vmov 0.0   ;;  %vm2505_vm0 = vmmov 0   ;;  %v560_v0 = vlaneseq  ;;  %s2506_s7 = smov 120  }
  0x8f   : > { %v2781_v5 = vld [vmem:[%s2769_s8] sm:$0xff]  ;;  %v1877_v6 = vmul.f32 -1.442695, %v523_v3  ;;  %v1878_v7 = vmul.f32 -1.442695, %v524_v4  ;;  %2240 = vset.pattern.permute.xlu1 %v2503_v8  ;;  %2241 = vset.pattern.permute.xlu0 %v2503_v8  ;;  %v2808_v22 = vld [vmem:[%s2769_s8 + $0x8] sm:$0xff] }
  0x90   : > { %v556_v9 = vmul.f32 1.442695, %v2781_v5  ;;  %569 = vperm.xlu1 %2240, %v2781_v5   ;;  %1971 = vmatprep.subr.bf16.mxu1 %v2504_v10  ;;  %v558_v29 = vmul.f32 1.442695, %v2808_v22  ;;  %v2830_v36 = vld [vmem:[#allocation2 + $0x8] sm:$0xff]  ;;  %v2840_v39 = vld [vmem:[#allocation2 + $0x50] sm:$0xff] }
  0x91   : > { %2242 = vpow2.f32 %v1877_v6  ;;  %1965 = vmatprep.subr.bf16.mxu0 %v2504_v10  ;;  %v2822_v33 = vld [vmem:[#allocation2 + $0x40] sm:$0xff]  ;;  %v2832_v37 = vld [vmem:[#allocation2 + $0x48] sm:$0xff]  ;;  %v2852_v43 = vld [vmem:[#allocation2 + $0x58] sm:$0xff]  ;;  %1987 = vmatprep.mubr.msk.bf16.mxu1 %vm2505_vm0, %v2504_v10  ;;  %v561_v1 = vshrl.u32 %v560_v0, 7  ;;  %v564_v6 = vand.u32 127, %v560_v0  ;;  %vm725_vm5 = vcmask 1043456  }
  0x92   : > { %2244 = vpow2.f32 %v1878_v7  ;;  %v2812_v30 = vld [vmem:[#allocation2 + $0x10] sm:$0xff]  ;;  %v2814_v31 = vld [vmem:[#allocation2 + $0x38] sm:$0xff]  ;;  %v2824_v34 = vld [vmem:[#allocation2 + $0x20] sm:$0xff]  ;;  %v2837_v38 = vpack.c.bf16 %v2832_v37, %v2830_v36  ;;  %1967 = vmatprep.mubr.msk.bf16.mxu0 %vm2505_vm0, %v2504_v10  ;;  %vm721_vm6 = vcmask 64512   ;;  %vm1320_vm7 = vcmask 130048   ;;  %s3206_s24 = sld [smem:[#allocation16_spill]] }
  0x93   : > { %v2794_v14 = vld [vmem:[#allocation2 + $0x60] sm:$0xff]  ;;  %v2796_v15 = vld [vmem:[#allocation2 + $0x70] sm:$0xff]  ;;  %2246 = vpow2.f32 %v556_v9  ;;  %v2818_v32 = vpack.c.bf16 %v2814_v31, %v2812_v30  ;;  %v2828_v35 = vpack.c.bf16 %v2824_v34, %v2822_v33  ;;  %v2842_v40 = vld [vmem:[#allocation2 + $0x68] sm:$0xff]  ;;  %v579_v2 = vsub.s32 0, %v561_v1  ;;  %s3207_s5 = sld [smem:[#allocation17_spill]]  ;;  %s1646_s21 = sshll.u32 %s2773_s17, 4  ;;  %s3062_s21 = int_to_ptr.vmem [resolvable:$true] %s1646_s21 }
  0x94   : > { %v2786_v11 = vld [vmem:[#allocation2 + $0x78] sm:$0xff]  ;;  %v2788_v12 = vld [vmem:[#allocation2 + $0x28] sm:$0xff]  ;;  %v2802_v16 = vpack.c.bf16 %v2796_v15, %v2794_v14  ;;  %v2847_v41 = vpack.c.bf16 %v2842_v40, %v2840_v39  ;;  %v2862_v46 = vld [vmem:[#allocation2 + $0x30] sm:$0xff]  ;;  %v562_v7 = vadd.s32 8, %v561_v1  ;;  %vm565_vm1 = vcmp.lt.s32.totalorder %v564_v6, %v561_v1  ;;  %s3208_s26 = sld [smem:[#allocation18_spill]] }
  0x95   : > { %v2792_v13 = vpack.c.bf16 %v2788_v12, %v2786_v11  ;;  %v2854_v44 = vld [vmem:[#allocation2 + $0x18] sm:$0xff]  ;;  %v2864_v47 = vld [vmem:[#allocation2] sm:$0xff]  ;;  %vm1263_vm3 = vcmp.eq.s32.totalorder %v561_v1, %v564_v6  ;;  %s3210_s18 = sld [smem:[#allocation28_spill]] }
  0x96   : > { %v2858_v45 = vpack.c.bf16 %v2854_v44, %v2852_v43  ;;  %v2868_v48 = vpack.c.bf16 %v2864_v47, %v2862_v46  ;;  %vm566_vm2 = vcmp.lt.s32.totalorder %v564_v6, %v562_v7  ;;  %vm1264_vm4 = vcmp.eq.s32.totalorder %v562_v7, %v564_v6 }
  0x97   : > { %1972 = vmatpush3.bf16.msra.mxu1 %v2792_v13 }
  0x98   : > { %1973 = vmatprep.subr.bf16.mxu1 %v2504_v10  ;;  %s1909_s0 = sshll.u32 %s3206_s24, 2  ;;  %s2509_s24 = smov [#allocation10]  }
  0x99   : > { %s1641_s6 = sadd.s32 %s3207_s5, %s1909_s0  ;;  %s2358_s5 = sshll.u32 %s2509_s24, 4  ;;  %s2359_s5 = int_to_ptr.vmem [resolvable:$false] %s2358_s5 }
  0x9a   : > { %s1902_s9 = sshll.u32 %s3208_s26, 3  ;;  %s2360_s26 = scalar_lea.vmem %s2359_s5, 512 }
  0x9b   : > { %1974 = vmatpush3.bf16.msra.mxu1 %v2802_v16  ;;  %s1643_s12 = sadd.s32 %s1902_s9, %s1641_s6  ;;  %s3211_s8 = smov %s3210_s18 }
  0x9c   : > { %1975 = vmatprep.subr.bf16.mxu1 %v2504_v10  ;;  %s1903_s15 = sshll.u32 %s1643_s12, 7  ;;  %p2361_p9 = scmp.lt.s32.totalorder %s3062_s21, %s2359_s5 }
  0x9e   : > { %v2243_v17 = vpop.eup %2242 }
  0x9f   : > { %v2245_v18 = vpop.eup %2244  ;;  %v531_v19 = vadd.f32 1.0, %v2243_v17  ;;  %1976 = vmatpush3.bf16.msra.mxu1 %v2818_v32 }
  0xa0   : > { %v2247_v20 = vpop.eup %2246  ;;  %v532_v21 = vadd.f32 1.0, %v2245_v18  ;;  %1977 = vmatprep.subr.bf16.mxu1 %v2504_v10 }
  0xa1   : > { %2248 = vrcp.f32 %v531_v19  ;;  %657 = vperm.xlu1 %2240, %v2247_v20  }
  0xa2   : > { %2250 = vrcp.f32 %v532_v21 }
  0xa3   : > { %2252 = vpow2.f32 %v558_v29  ;;  %1978 = vmatpush3.bf16.msra.mxu1 %v2828_v35  ;;  %v1266_v29 = vsel %vm1264_vm4, 1.0, %v2504_v10 }
  0xa4   : > { %1979 = vmatprep.subr.bf16.mxu1 %v2504_v10 }
  0xa5   : > { %574 = vperm.xlu1 %2240, %v2808_v22  }
  0xa7   : > { %1980 = vmatpush3.bf16.msra.mxu1 %v2837_v38 }
  0xa8   : > { %1981 = vmatprep.subr.bf16.mxu1 %v2504_v10 }
  0xab   : > { %1982 = vmatpush3.bf16.msra.mxu1 %v2847_v41 }
  0xac   : > { %1983 = vmatprep.subr.bf16.mxu1 %v2504_v10 }
  0xae   : > { %v2249_v23 = vpop.eup %2248 }
  0xaf   : > { %v2251_v24 = vpop.eup %2250  ;;  %v537_v25 = vmul.f32 %v2249_v23, %v523_v3  ;;  %1984 = vmatpush3.bf16.msra.mxu1 %v2858_v45  ;;  %v555_v3 = vld [vmem:[%s389_s25] sm:$0x3]  ;;  %v633_v23 = vsub.s32 1, %v561_v1  ;;  %s2507_s25 = smov 8  }
  0xb0   : > { %v538_v26 = vmul.f32 %v2251_v24, %v524_v4  ;;  %v2253_v42 = vpop.eup %2252  ;;  %1985 = vmatprep.subr.bf16.mxu1 %v2504_v10  ;;  %v580_v4 = vrot.slane %v555_v3, %v579_v2 }
  0xb1   : > { %v539_v27 = vmul.f32 %v537_v25, %v537_v25 }
  0xb2   : > { %v540_v28 = vmul.f32 %v538_v26, %v538_v26 }
  0xb3   : > { %541 = vadd.xlane.f32.xlu0 %v539_v27  ;;  %1986 = vmatpush3.bf16.msra.mxu1 %v2868_v48  ;;  %v634_v27 = vrot.slane %v555_v3, %v633_v23 }
  0xb4   : > { %2015 = vmatprep.subr.bf16.mxu1 %v2504_v10 }
  0xb7   : > { %543 = vadd.xlane.f32.xlu0 %v540_v28 }
  0xcd   : > { %662 = vperm.xlu0 %2241, %v2253_v42  }
 0x10b   : > { %v570_v53 = vpop.permute.xlu1 %569 }
 0x10c   : > { %v581_v9 = vsub.f32 %v570_v53, %v580_v4 }
 0x10e   : > { %v583_v18 = vsel %vm565_vm1, %v581_v9, -inf }
 0x10f   : > { %v585_v20 = vmul.f32 1.442695, %v583_v18 }
 0x11c   : > { %v2878_v57 = vpop.permute.xlu1 %657 }
 0x120   : > { %v575_v8 = vpop.permute.xlu1 %574 }
 0x121   : > { %v582_v17 = vsub.f32 %v575_v8, %v580_v4 }
 0x123   : > { %v584_v19 = vsel %vm566_vm2, %v582_v17, -inf }
 0x124   : > { %v587_v21 = vmul.f32 1.442695, %v584_v19 }
 0x13c   : > { %v542_v49 = vpop.xlane.xlu0 %541 }
 0x13d   : > { %v545_v50 = vadd.f32 1e-12, %v542_v49 }
 0x13f   : > { %2254 = vrsqrt.f32 %v545_v50 }
 0x140   : > { %v544_v51 = vpop.xlane.xlu0 %543 }
 0x141   : > { %v546_v52 = vadd.f32 1e-12, %v544_v51  ;;  %v551_v51 = vld [vmem:[%s414_s16] sm:$0xff] }
 0x143   : > { %2256 = vrsqrt.f32 %v546_v52 }
 0x144   : > { %2258 = vpow2.f32 %v585_v20 }
 0x145   : > { %2260 = vpow2.f32 %v587_v21 }
 0x148   : > { %v2880_v58 = vpop.permute.xlu0 %662 }
 0x14c   : > { %v2255_v54 = vpop.eup %2254 }
 0x14d   : > { %v2876_v55 = vmul.f32 %v2255_v54, %v537_v25 }
 0x14f   : > { %v665_v60 = vmul.f32 %v2878_v57, %v2876_v55 }
 0x150   : > { %v2257_v56 = vpop.eup %2256 }
 0x151   : > { %v2882_v59 = vmul.f32 %v2257_v56, %v538_v26  ;;  %v2259_v24 = vpop.eup %2258  ;;  %v1265_v26 = vsel %vm1263_vm3, 1.0, %v2504_v10 }
 0x152   : > { %v2261_v25 = vpop.eup %2260  ;;  %v1267_v28 = vadd.f32 %v2259_v24, %v1265_v26  ;;  %v635_v56 = vmul.f32 %v2259_v24, %v634_v27 }
 0x153   : > { %v666_v61 = vmul.f32 %v2880_v58, %v2882_v59  ;;  %v2890_v62 = vpack.c.bf16 %v2882_v59, %v2876_v55  ;;  %v1268_v42 = vadd.f32 %v2261_v25, %v1266_v29  ;;  %v636_v6 = vmul.f32 %v2261_v25, %v634_v27 }
 0x154   : > { %v2903_v49 = vmul.f32 %v1267_v28, %v634_v27 }
 0x155   : > { %v667_v63 = vpack.c.bf16 %v666_v61, %v665_v60  ;;  %1966 = vmatpush3.bf16.xpose.msra.mxu0 %v2890_v62  ;;  %v2905_v50 = vmul.f32 %v1268_v42, %v634_v27 }
 0x156   : > { %1991 = vmatprep.subr.bf16.mxu0 %v2504_v10 }
 0x157   : > { %1988 = vmatmul.mubr.bf16.vlgmr.msra.gmra.mxu1 %v667_v63 }
 0x158   : > { %2017 = vmatprep.mubr.msk.bf16.mxu1 %vm2505_vm0, %v2504_v10 }
 0x15c   : > { %1968 = vmatmul.mubr.bf16.vlgmr.msra.gmra.mxu0 %v2890_v62 }
 0x15d   : > { %1993 = vmatprep.mubr.msk.bf16.mxu0 %vm2505_vm0, %v2504_v10 }
 0x217   : > { %v710_v52 = vpop.f32.mrf.mxu1 }
 0x218   : > { %v2909_v53 = vsub.f32 %v551_v51, %v710_v52 }
 0x219   : > { %v1989_v54 = vpop.f32.mrf.mxu1 }
 0x21a   : > { %v907_v60 = vpack.c.bf16 %v2909_v53, %v2909_v53 }
 0x21b   : > { %v2913_v61 = vpop.f32.mrf.mxu1 }
 0x21c   : > { %v624_v63 = vpop.f32.mrf.mxu0  ;;  %v912_v0 = vsel %vm725_vm5, %v907_v60, 0 }
 0x21d   : > { %v637_v1 = vmul.f32 %v635_v56, %v624_v63  ;;  %v1990_v2 = vpop.f32.mrf.mxu1  ;;  %2016 = vmatpush3.bf16.msra.mxu1 %v912_v0 }
 0x21e   : > { %v1969_v3 = vpop.f32.mrf.mxu0  ;;  %2027 = vmatprep.subr.bf16.mxu1 %v2504_v10 }
 0x21f   : > { %v719_v4 = vsub.f32 0.0, %v637_v1 }
 0x220   : > { %v627_v7 = vpop.f32.mrf.mxu0 }
 0x221   : > { %v720_v8 = vpack.c.bf16 %v719_v4, %v719_v4  ;;  %v2917_v9 = vmul.f32 %v636_v6, %v627_v7 }
 0x222   : > { %v1970_v17 = vpop.f32.mrf.mxu0 }
 0x223   : > { %v2920_v18 = vsub.f32 0.0, %v2917_v9  ;;  %v726_v19 = vsel %vm725_vm5, %v720_v8, 0 }
 0x224   : > { %1992 = vmatpush3.bf16.msra.mxu0 %v726_v19 }
 0x225   : > { %1997 = vmatprep.subr.bf16.mxu0 %v2504_v10  ;;  %v1005_v20 = vpack.c.bf16 %v2920_v18, %v2920_v18 }
 0x227   : > { %1994 = vmatmul.mubr.msk.bf16.vlgmr.msra.gmra.mxu0 %vm721_vm6, %v720_v8  ;;  %1007 = vrot.lane.b32.xlu1 %v1005_v20, %s2506_s7 }
 0x228   : > { %1998 = vmatpush3.bf16.msra.mxu0 %v726_v19  ;;  %1999 = vmatprep.mubr.msk.bf16.mxu0 %vm2505_vm0, %v2504_v10 }
 0x229   : > { %2003 = vmatprep.subr.bf16.mxu0 %v2504_v10 }
 0x299   : > { %v1008_v8 = vpop.permute.xlu1 %1007 }
 0x2e7   : > { %v762_v21 = vpop.f32.mrf.mxu0 }
 0x2e8   : > { %v769_v23 = vpack.c.bf16 %v762_v21, %v762_v21  ;;  %v768_v28 = vadd.f32 %v762_v21, %v719_v4  ;;  %v1012_v21 = vsel %vm725_vm5, %v1008_v8, 0 }
 0x2e9   : > { %v1995_v24 = vpop.f32.mrf.mxu0 }
 0x2ea   : > { %2000 = vmatmul.mubr.msk.bf16.vlgmr.msra.gmra.mxu0 %vm721_vm6, %v769_v23  ;;  %v814_v25 = vsel %vm725_vm5, %v769_v23, 0 }
 0x2eb   : > { %v765_v26 = vpop.f32.mrf.mxu0  ;;  %2004 = vmatpush3.bf16.msra.mxu0 %v814_v25  ;;  %2005 = vmatprep.mubr.msk.bf16.mxu0 %vm2505_vm0, %v2504_v10 }
 0x2ec   : > { %2009 = vmatprep.subr.bf16.mxu0 %v2504_v10 }
 0x2ed   : > { %v1996_v27 = vpop.f32.mrf.mxu0 }
 0x2f2   : > { %2006 = vmatmul.mubr.msk.bf16.vlgmr.msra.gmra.mxu0 %vm721_vm6, %v769_v23 }
 0x2f3   : > { %2011 = vmatprep.mubr.msk.bf16.mxu0 %vm2505_vm0, %v2504_v10 }
 0x3aa   : > { %v807_v29 = vpop.f32.mrf.mxu0 }
 0x3ab   : > { %v813_v42 = vadd.f32 %v807_v29, %v768_v28 }
 0x3ac   : > { %v2001_v51 = vpop.f32.mrf.mxu0 }
 0x3ad   : > { %v858_v52 = vpack.c.bf16 %v813_v42, %v813_v42  ;;  %v955_v51 = vpack.c.bf16 %v2917_v9, %v2917_v9 }
 0x3ae   : > { %v810_v54 = vpop.f32.mrf.mxu0 }
 0x3af   : > { %v863_v56 = vsel %vm725_vm5, %v858_v52, 0 }
 0x3b0   : > { %v2002_v60 = vpop.f32.mrf.mxu0  ;;  %2010 = vmatpush3.bf16.msra.mxu0 %v863_v56 }
 0x3b1   : > { %2021 = vmatprep.subr.bf16.mxu0 %v2504_v10 }
 0x3b2   : > { %v850_v63 = vpop.f32.mrf.mxu0 }
 0x3b3   : > { %v856_v0 = vadd.f32 %v850_v63, %v813_v42  ;;  %v857_v1 = vpack.c.bf16 %v850_v63, %v850_v63  ;;  %v552_v63 = vld [vmem:[%s414_s16 + $0x8] sm:$0xff]  ;;  %s3060_s16 = scalar_lea.hbm %s3210_s18, %s1903_s15 }
 0x3b4   : > { %v2007_v2 = vpop.f32.mrf.mxu0 }
 0x3b5   : > { %2012 = vmatmul.mubr.msk.bf16.vlgmr.msra.gmra.mxu0 %vm721_vm6, %v857_v1 }
 0x3b6   : > { %v853_v3 = vpop.f32.mrf.mxu0  ;;  %2023 = vmatprep.mubr.msk.bf16.mxu0 %vm2505_vm0, %v2504_v10 }
 0x3b8   : > { %v2008_v4 = vpop.f32.mrf.mxu0 }
 0x475   : > { %v899_v6 = vpop.f32.mrf.mxu0 }
 0x476   : > { %v905_v7 = vadd.f32 %v899_v6, %v856_v0  ;;  %v718_v0 = vsub.f32 %v552_v63, %v2913_v61 }
 0x477   : > { %v2013_v17 = vpop.f32.mrf.mxu0 }
 0x478   : > { %v906_v19 = vpack.c.bf16 %v905_v7, %v905_v7 }
 0x479   : > { %v902_v20 = vpop.f32.mrf.mxu0 }
 0x47a   : > { %2018 = vmatmul.mubr.msk.bf16.vlgmr.msra.gmra.mxu1 %vm721_vm6, %v906_v19 }
 0x47b   : > { %2028 = vmatpush3.bf16.msra.mxu1 %v1012_v21  ;;  %v2014_v23 = vpop.f32.mrf.mxu0  ;;  %2029 = vmatprep.mubr.msk.bf16.mxu1 %vm2505_vm0, %v2504_v10 }
 0x47c   : > { %2039 = vmatprep.subr.bf16.mxu1 %v2504_v10 }
 0x482   : > { %2030 = vmatmul.mubr.msk.bf16.vlgmr.msra.gmra.mxu1 %vm721_vm6, %v1008_v8 }
 0x483   : > { %2041 = vmatprep.mubr.msk.bf16.mxu1 %vm2505_vm0, %v2504_v10 }
 0x53a   : > { %v948_v24 = vpop.f32.mrf.mxu1 }
 0x53b   : > { %v2953_v25 = vadd.f32 %v948_v24, %v2909_v53 }
 0x53c   : > { %v2019_v26 = vpop.f32.mrf.mxu1 }
 0x53d   : > { %v956_v27 = vpack.c.bf16 %v2953_v25, %v2953_v25 }
 0x53e   : > { %v951_v28 = vpop.f32.mrf.mxu1 }
 0x53f   : > { %v961_v29 = vsel %vm725_vm5, %v956_v27, 0 }
 0x540   : > { %v2020_v42 = vpop.f32.mrf.mxu1  ;;  %2022 = vmatpush3.bf16.msra.mxu0 %v961_v29 }
 0x541   : > { %2033 = vmatprep.subr.bf16.mxu0 %v2504_v10 }
 0x542   : > { %v1048_v52 = vpop.f32.mrf.mxu1 }
 0x543   : > { %v1059_v54 = vpack.c.bf16 %v1048_v52, %v1048_v52  ;;  %2024 = vmatmul.mubr.msk.bf16.vlgmr.msra.gmra.mxu0 %vm721_vm6, %v955_v51  ;;  %1055 = vrot.lane.b32.xlu1 %v1048_v52, %s2507_s25  ;;  %v507_v52 = vld [vmem:[%s397_s13] sm:$0xff] }
 0x544   : > { %v2031_v53 = vpop.f32.mrf.mxu1  ;;  %2034 = vmatpush3.bf16.msra.mxu0 %v1012_v21  ;;  %2035 = vmatprep.mubr.msk.bf16.mxu0 %vm2505_vm0, %v2504_v10 }
 0x545   : > { %v1108_v56 = vsel %vm725_vm5, %v1059_v54, 0  ;;  %2045 = vmatprep.subr.bf16.mxu0 %v2504_v10  ;;  %v1875_v53 = vmul.f32 -1.442695, %v507_v52 }
 0x546   : > { %v1051_v9 = vpop.f32.mrf.mxu1  ;;  %2040 = vmatpush3.bf16.msra.mxu1 %v1108_v56 }
 0x547   : > { %2051 = vmatprep.subr.bf16.mxu1 %v2504_v10  ;;  %2262 = vpow2.f32 %v1875_v53 }
 0x548   : > { %v2032_v60 = vpop.f32.mrf.mxu1 }
 0x549   : > { %2042 = vmatmul.mubr.msk.bf16.vlgmr.msra.gmra.mxu1 %vm721_vm6, %v1059_v54 }
 0x54a   : > { %2053 = vmatprep.mubr.msk.bf16.mxu1 %vm2505_vm0, %v2504_v10 }
 0x54b   : > { %2036 = vmatmul.mubr.msk.bf16.vlgmr.msra.gmra.mxu0 %vm721_vm6, %v1059_v54  ;;  %v508_v54 = vld [vmem:[%s397_s13 + $0x8] sm:$0xff]  ;;  %s2508_s13 = smov 127  }
 0x54c   : > { %2047 = vmatprep.mubr.msk.bf16.mxu0 %vm2505_vm0, %v2504_v10  ;;  %v1876_v56 = vmul.f32 -1.442695, %v508_v54 }
 0x54e   : > { %2264 = vpow2.f32 %v1876_v56 }
 0x554   : > { %v2263_v9 = vpop.eup %2262 }
 0x555   : > { %v515_v60 = vadd.f32 1.0, %v2263_v9 }
 0x557   : > { %2266 = vrcp.f32 %v515_v60 }
 0x5b5   : > { %v1056_v27 = vpop.permute.xlu1 %1055 }
 0x5b6   : > { %v1058_v28 = vadd.f32 %v1056_v27, %v2920_v18  ;;  %v2265_v18 = vpop.eup %2264 }
 0x5b7   : > { %v516_v63 = vadd.f32 1.0, %v2265_v18 }
 0x5b9   : > { %2268 = vrcp.f32 %v516_v63 }
 0x603   : > { %v997_v1 = vpop.f32.mrf.mxu0 }
 0x604   : > { %v2977_v2 = vsub.f32 %v718_v0, %v997_v1 }
 0x605   : > { %v2025_v3 = vpop.f32.mrf.mxu0 }
 0x606   : > { %v1212_v4 = vpack.c.bf16 %v2977_v2, %v2977_v2  ;;  %v2267_v3 = vpop.eup %2266 }
 0x607   : > { %v1000_v6 = vpop.f32.mrf.mxu0 }
 0x608   : > { %v1220_v7 = vsel %vm725_vm5, %v1212_v4, 0  ;;  %v2269_v6 = vpop.eup %2268 }
 0x609   : > { %v2026_v8 = vpop.f32.mrf.mxu0  ;;  %v1144_v17 = vpop.f32.mrf.mxu1  ;;  %2052 = vmatpush3.bf16.msra.mxu1 %v1220_v7  ;;  %v521_v7 = vmul.f32 %v2267_v3, %v507_v52 }
 0x60a   : > { %2063 = vmatprep.subr.bf16.mxu1 %v2504_v10  ;;  %v1155_v4 = vpack.c.bf16 %v1144_v17, %v1144_v17  ;;  %v522_v8 = vmul.f32 %v2269_v6, %v508_v54 }
 0x60b   : > { %v1097_v19 = vpop.f32.mrf.mxu0  ;;  %v2043_v20 = vpop.f32.mrf.mxu1 }
 0x60c   : > { %1104 = vrot.lane.b32.xlu1 %v1097_v19, %s2507_s25  ;;  %v1271_v19 = vpack.c.bf16 %v522_v8, %v521_v7 }
 0x60d   : > { %v2037_v61 = vpop.f32.mrf.mxu0  ;;  %v1147_v21 = vpop.f32.mrf.mxu1 }
 0x60f   : > { %v1100_v23 = vpop.f32.mrf.mxu0  ;;  %v2044_v24 = vpop.f32.mrf.mxu1 }
 0x611   : > { %v2038_v26 = vpop.f32.mrf.mxu0 }
 0x67e   : > { %v1105_v29 = vpop.permute.xlu1 %1104 }
 0x67f   : > { %v2985_v42 = vadd.f32 %v1105_v29, %v1058_v28 }
 0x681   : > { %v1156_v51 = vpack.c.bf16 %v2985_v42, %v2985_v42 }
 0x683   : > { %1158 = vrot.lane.b32.xlu1 %v1156_v51, %s2506_s7 }
 0x687   : > { %1151 = vrot.lane.b32.xlu1 %v1144_v17, %s2507_s25 }
 0x6f5   : > { %v1159_v0 = vpop.permute.xlu1 %1158 }
 0x6f6   : > { %v1164_v1 = vsel %vm725_vm5, %v1159_v0, 0 }
 0x6f7   : > { %2046 = vmatpush3.bf16.msra.mxu0 %v1164_v1 }
 0x6f8   : > { %2057 = vmatprep.subr.bf16.mxu0 %v2504_v10 }
 0x6f9   : > { %v1152_v52 = vpop.permute.xlu1 %1151 }
 0x6fa   : > { %2048 = vmatmul.mubr.msk.bf16.vlgmr.msra.gmra.mxu0 %vm721_vm6, %v1155_v4 }
 0x6fb   : > { %2058 = vmatpush3.bf16.xpose.msra.mxu0 %v2890_v62  ;;  %2059 = vmatprep.mubr.msk.bf16.mxu0 %vm2505_vm0, %v2504_v10 }
 0x6fc   : > { %2069 = vmatprep.subr.bf16.mxu0 %v2504_v10 }
 0x702   : > { %2060 = vmatmul.mubr.bf16.vlgmr.msra.gmra.mxu0 %v1271_v19 }
 0x703   : > { %2070 = vmatpush3.bf16.msra.mxu0 %v2792_v13  ;;  %2085 = vmatprep.mubr.msk.bf16.mxu0 %vm2505_vm0, %v2504_v10  ;;  %v1315_v13 = vmul.f32 %v2878_v57, %v521_v7 }
 0x704   : > { %2071 = vmatprep.subr.bf16.mxu0 %v2504_v10 }
 0x707   : > { %2072 = vmatpush3.bf16.msra.mxu0 %v2802_v16  ;;  %v1316_v16 = vmul.f32 %v2880_v58, %v522_v8 }
 0x708   : > { %2073 = vmatprep.subr.bf16.mxu0 %v2504_v10 }
 0x70b   : > { %2074 = vmatpush3.bf16.msra.mxu0 %v2818_v32  ;;  %v1317_v32 = vpack.c.bf16 %v1316_v16, %v1315_v13 }
 0x70c   : > { %2075 = vmatprep.subr.bf16.mxu0 %v2504_v10 }
 0x70f   : > { %2076 = vmatpush3.bf16.msra.mxu0 %v2828_v35 }
 0x710   : > { %2077 = vmatprep.subr.bf16.mxu0 %v2504_v10 }
 0x713   : > { %2078 = vmatpush3.bf16.msra.mxu0 %v2837_v38  ;;  %v1408_v38 = vrot.slane %v2808_v22, 7 }
 0x714   : > { %2079 = vmatprep.subr.bf16.mxu0 %v2504_v10 }
 0x715   : > { %2107 = vpush %v1408_v38 }
 0x717   : > { %2080 = vmatpush3.bf16.msra.mxu0 %v2847_v41 }
 0x718   : > { %2081 = vmatprep.subr.bf16.mxu0 %v2504_v10 }
 0x71b   : > { %2082 = vmatpush3.bf16.msra.mxu0 %v2858_v45 }
 0x71c   : > { %2083 = vmatprep.subr.bf16.mxu0 %v2504_v10 }
 0x71f   : > { %2084 = vmatpush3.bf16.msra.mxu0 %v2868_v48 }
 0x722   : > { %2086 = vmatmul.mubr.bf16.vlgmr.msra.gmra.mxu0 %v1317_v32 }
 0x746   : > { %s2108_s14 = spop %2107 }
 0x747   : > { %v1410_v28 = vstv %s2108_s14 }
 0x748   : > { %v1438_v29 = vmul.f32 1.442695, %v1410_v28  ;;  %v1411_v56 = vsub.f32 %v1410_v28, %v2781_v5  ;;  %v1412_v9 = vsub.f32 %v1410_v28, %v2808_v22 }
 0x74a   : > { %2270 = vpow2.f32 %v1438_v29  ;;  %v1413_v18 = vmul.f32 1.442695, %v1411_v56  ;;  %v1415_v60 = vmul.f32 1.442695, %v1412_v9 }
 0x74c   : > { %2272 = vpow2.f32 %v1413_v18 }
 0x74d   : > { %2274 = vpow2.f32 %v1415_v60 }
 0x757   : > { %v2271_v51 = vpop.eup %2270 }
 0x758   : > { %2109 = vpush %v2271_v51 }
 0x7ba   : > { %v1200_v35 = vpop.f32.mrf.mxu0 }
 0x7bb   : > { %1207 = vrot.lane.b32.xlu1 %v1200_v35, %s2507_s25 }
 0x7bc   : > { %v2049_v41 = vpop.f32.mrf.mxu0 }
 0x7be   : > { %v1203_v62 = vpop.f32.mrf.mxu0 }
 0x7c0   : > { %v2050_v17 = vpop.f32.mrf.mxu0 }
 0x7c2   : > { %v1306_v45 = vpop.f32.mrf.mxu0 }
 0x7c3   : > { %v1313_v57 = vmul.f32 %v1306_v45, %v2903_v49  ;;  %v1154_v49 = vadd.f32 %v1152_v52, %v2985_v42  ;;  %v2273_v42 = vpop.eup %2272 }
 0x7c4   : > { %v2061_v20 = vpop.f32.mrf.mxu0  ;;  %v2275_v3 = vpop.eup %2274 }
 0x7c6   : > { %v1309_v58 = vpop.f32.mrf.mxu0 }
 0x7c7   : > { %v1314_v61 = vmul.f32 %v1309_v58, %v2905_v50 }
 0x7c8   : > { %v2062_v21 = vpop.f32.mrf.mxu0 }
 0x7c9   : > { %v1318_v48 = vpack.c.bf16 %v1314_v61, %v1313_v57 }
 0x7e2   : > { %v3025_v23 = vpop.f32.mrf.mxu0 }
 0x7e4   : > { %v2087_v24 = vpop.f32.mrf.mxu0 }
 0x7e6   : > { %v3027_v26 = vpop.f32.mrf.mxu0 }
 0x7e8   : > { %v2088_v27 = vpop.f32.mrf.mxu0 }
 0x82d   : > { %v1208_v54 = vpop.permute.xlu1 %1207 }
 0x82e   : > { %v1210_v53 = vadd.f32 %v1208_v54, %v1154_v49 }
 0x830   : > { %v1211_v50 = vpack.c.bf16 %v1210_v53, %v1210_v53 }
 0x832   : > { %1214 = vrot.lane.b32.xlu1 %v1211_v50, %s2506_s7  ;;  %s3212_s7 = sand.u32 1, %s2450_s19  }
 0x833   : > { %s3068_s14 = scalar_lea.sflag [#allocation5], %s3212_s7 }
 0x836   : > { %1417 = vrot.lane.b32.xlu1 %v2781_v5, %s2508_s13 }
 0x83a   : > { %1419 = vrot.lane.b32.xlu1 %v2808_v22, %s2508_s13  ;;  %s2354_s13 = scalar_lea.vmem %s3062_s21, 256 }
 0x83b   : > { %p2355_p5 = scmp.ne.s32.totalorder %s3062_s21, %s2354_s13  ;;  %p2362_p10 = scmp.lt.s32.totalorder %s2360_s26, %s2354_s13 }
 0x83d   : > { %p2356_p6 = pnand %p2355_p5, %p2670_p3  ;;  %p2363_p13 = por %p2362_p10, %p2361_p9 }
 0x83f   : > { %p2357_p8 = pneg %p2356_p6 }
 0x841   : > { %p2364_p0 = pnand %p2363_p13, %p2357_p8 }
 0x8a4   : > { %v1215_v63 = vpop.permute.xlu1 %1214 }
 0x8a5   : > { %2054 = vmatmul.mubr.msk.bf16.vlgmr.msra.gmra.mxu1 %vm721_vm6, %v1215_v63 }
 0x8a6   : > { %2065 = vmatprep.mubr.msk.bf16.mxu1 %vm2505_vm0, %v2504_v10 }
 0x8a8   : > { %v1418_v0 = vpop.permute.xlu1 %1417 }
 0x8a9   : > { %v1423_v1 = vmul.f32 %v2273_v42, %v1418_v0 }
 0x8ab   : > { %1427 = vperm.xlu1 %2240, %v1423_v1  }
 0x8ac   : > { %v1420_v4 = vpop.permute.xlu1 %1419 }
 0x8ad   : > { %v1424_v6 = vmul.f32 %v2275_v3, %v1420_v4 }
 0x8af   : > { %1432 = vperm.xlu0 %2241, %v1424_v6  }
 0x926   : > { %v1428_v5 = vpop.permute.xlu1 %1427 }
 0x927   : > { %v1435_v7 = vmul.f32 %v1428_v5, %v2876_v55 }
 0x92a   : > { %v1433_v22 = vpop.permute.xlu0 %1432 }
 0x92b   : > { %v1436_v8 = vmul.f32 %v1433_v22, %v2882_v59 }
 0x92d   : > { %v1458_v19 = vpack.c.bf16 %v1436_v8, %v1435_v7 }
 0x92f   : > { %1459 = vxpose.xlu1.c.b16.start.end [1/1] (short) %v1458_v19, 128 }
 0x965   : > { %v1256_v13 = vpop.f32.mrf.mxu1 }
 0x966   : > { %v1262_v16 = vadd.f32 %v1256_v13, %v2977_v2 }
 0x967   : > { %v2055_v32 = vpop.f32.mrf.mxu1 }
 0x968   : > { %v1319_v10 = vpack.c.bf16 %v1262_v16, %v2953_v25 }
 0x969   : > { %v1259_v35 = vpop.f32.mrf.mxu1 }
 0x96a   : > { %2064 = vmatpush3.bf16.msra.mxu1 %v1319_v10 }
 0x96b   : > { %v2056_v38 = vpop.f32.mrf.mxu1  ;;  %2089 = vmatprep.subr.bf16.mxu1 %v1319_v10 }
 0x96d   : > { %2066 = vmatmul.mubr.msk.bf16.vlgmr.msra.gmra.mxu1 %vm1320_vm7, %v1318_v48 }
 0x96e   : > { %2090 = vmatpush3.bf16.msra.mxu1 %v1319_v10 }
 0x991   : > { %v1467_v41 = vpop.trf.xlu1 }
 0x992   : > { %2091 = vmatprep.mubr.msk.bf16.mxu1 %vm1320_vm7, %v1467_v41 }
 0x995   : > { %v1468_v55 = vpop.trf.xlu1 }
 0x996   : > { %2092 = vmatmul.mubr.msk.bf16.vlgmr.msra.gmra.mxu1 %vm1320_vm7, %v1468_v55 }
 0x999   : > { %v1469_v59 = vpop.trf.xlu1 }
 0x99a   : > { %2095 = vmatprep.mubr.msk.bf16.mxu1 %vm1320_vm7, %v1469_v59 }
 0x99d   : > { %v1470_v25 = vpop.trf.xlu1 }
 0x99e   : > { %2096 = vmatmul.mubr.msk.bf16.gmra.mxu1 %vm1320_vm7, %v1470_v25 }
 0x9a1   : > { %v1471_v2 = vpop.trf.xlu1 }
 0x9a2   : > { %2099 = vmatprep.mubr.msk.bf16.mxu1 %vm1320_vm7, %v1471_v2 }
 0x9a5   : > { %v1472_v62 = vpop.trf.xlu1 }
 0x9a6   : > { %2100 = vmatmul.mubr.msk.bf16.gmra.mxu1 %vm1320_vm7, %v1472_v62 }
 0x9a9   : > { %v1473_v17 = vpop.trf.xlu1 }
 0x9aa   : > { %2103 = vmatprep.mubr.msk.bf16.mxu1 %vm1320_vm7, %v1473_v17 }
 0x9ad   : > { %v1474_v45 = vpop.trf.xlu1 }
 0x9ae   : > { %2104 = vmatmul.mubr.msk.bf16.gmra.mxu1 %vm1320_vm7, %v1474_v45 }
 0xa2d   : > { %v1358_v57 = vpop.f32.mrf.mxu1 }
 0xa2e   : > { %v1400_v20 = vadd.f32 %v3025_v23, %v1358_v57 }
 0xa2f   : > { %v2067_v58 = vpop.f32.mrf.mxu1 }
 0xa30   : > { %1406 = vst [vmem:[%s2773_s17] sm:$0xff] %v1400_v20 }
 0xa31   : > { %v1361_v61 = vpop.f32.mrf.mxu1 }
 0xa32   : > { %v1403_v21 = vadd.f32 %v3027_v26, %v1361_v61 }
 0xa33   : > { %v2068_v48 = vpop.f32.mrf.mxu1 }
 0xa34   : > { %1407 = vst [vmem:[%s2773_s17 + $0x8] sm:$0xff] %v1403_v21 }
 0xa35   : > { %2367 = shalt.err (!%p2364_p0)
}
 0xa36   : > { %s2368_s17 = scalar_lea.hbm %s3060_s16, 256  ;;  %s2372_s9 = scalar_lea.hbm %s3211_s8, 2048 }
 0xa37   : > { %p2369_p1 = scmp.ne.s32.totalorder %s3060_s16, %s2368_s17  ;;  %p2373_p2 = scmp.lt.s32.totalorder %s3060_s16, %s3211_s8 }
 0xa38   : > { %p2374_p12 = scmp.lt.s32.totalorder %s2372_s9, %s2368_s17 }
 0xa39   : > { %p2370_p7 = pnand %p2369_p1, %p2670_p3 }
 0xa3a   : > { %p2375_p5 = por %p2374_p12, %p2373_p2 }
 0xa3b   : > { %p2371_p11 = pneg %p2370_p7 }
 0xa3d   : > { %p2376_p6 = pnand %p2375_p5, %p2371_p11 }
 0xa3f   : > { %2379 = shalt.err (!%p2376_p6)
}
 0xa40   : > { %s2510_s11 = smov 128   ;;  %s2511_s23 = smov 256  }
 0xa41   : > { %2117 = dma.vmem_to_hbm [thread:$0]  (%p2670_p3), %s3062_s21, 256, %s3060_s16, %s3068_s14, %s2510_s11, %s2511_s23, %s2507_s25  }
 0xa42   : > { %s2110_s18 = spop %2109 }
 0xa43   : > { %v1441_v23 = vstv %s2110_s18 }
 0xa44   : > { %v1444_v24 = vmul.f32 %v1441_v23, %v2852_v43  ;;  %v1442_v28 = vmul.f32 %v1441_v23, %v2862_v46  ;;  %v1445_v52 = vmul.f32 %v1441_v23, %v2854_v44  ;;  %v1443_v53 = vmul.f32 %v1441_v23, %v2864_v47 }
 0xa45   : > { %v1448_v9 = vmul.f32 %v1441_v23, %v2830_v36  ;;  %v1446_v46 = vmul.f32 %v1441_v23, %v2840_v39  ;;  %v1449_v44 = vmul.f32 %v1441_v23, %v2832_v37  ;;  %v1447_v47 = vmul.f32 %v1441_v23, %v2842_v40 }
 0xa46   : > { %v1452_v36 = vmul.f32 %v1441_v23, %v2812_v30  ;;  %v1450_v39 = vmul.f32 %v1441_v23, %v2822_v33  ;;  %v1453_v37 = vmul.f32 %v1441_v23, %v2814_v31  ;;  %v1451_v40 = vmul.f32 %v1441_v23, %v2824_v34 }
 0xa47   : > { %v1456_v30 = vmul.f32 %v1441_v23, %v2786_v11  ;;  %v1454_v33 = vmul.f32 %v1441_v23, %v2794_v14  ;;  %v1457_v31 = vmul.f32 %v1441_v23, %v2788_v12  ;;  %v1455_v34 = vmul.f32 %v1441_v23, %v2796_v15 }
 0xa56   : > { %v2093_v26 = vpop.f32.mrf.mxu1 }
 0xa57   : > { %v1598_v27 = vadd.f32 %v2093_v26, %v1444_v24 }
 0xa58   : > { %v1533_v29 = vpop.f32.mrf.mxu1 }
 0xa59   : > { %1614 = vst [vmem:[#allocation2 + $0x58] sm:$0xff] %v1598_v27  ;;  %v1596_v51 = vadd.f32 %v1533_v29, %v1442_v28 }
 0xa5a   : > { %v2094_v49 = vpop.f32.mrf.mxu1 }
 0xa5b   : > { %1612 = vst [vmem:[#allocation2 + $0x30] sm:$0xff] %v1596_v51  ;;  %v1599_v54 = vadd.f32 %v2094_v49, %v1445_v52 }
 0xa5c   : > { %v1536_v50 = vpop.f32.mrf.mxu1 }
 0xa5d   : > { %1615 = vst [vmem:[#allocation2 + $0x18] sm:$0xff] %v1599_v54  ;;  %v1597_v56 = vadd.f32 %v1536_v50, %v1443_v53 }
 0xa5e   : > { %v2097_v43 = vpop.f32.mrf.mxu1 }
 0xa5f   : > { %1613 = vst [vmem:[#allocation2] sm:$0xff] %v1597_v56  ;;  %v1602_v18 = vadd.f32 %v2097_v43, %v1448_v9 }
 0xa60   : > { %v1549_v60 = vpop.f32.mrf.mxu1 }
 0xa61   : > { %1618 = vst [vmem:[#allocation2 + $0x8] sm:$0xff] %v1602_v18  ;;  %v1600_v63 = vadd.f32 %v1549_v60, %v1446_v46 }
 0xa62   : > { %v2098_v42 = vpop.f32.mrf.mxu1 }
 0xa63   : > { %1616 = vst [vmem:[#allocation2 + $0x50] sm:$0xff] %v1600_v63  ;;  %v1603_v0 = vadd.f32 %v2098_v42, %v1449_v44 }
 0xa64   : > { %v1552_v1 = vpop.f32.mrf.mxu1 }
 0xa65   : > { %1619 = vst [vmem:[#allocation2 + $0x48] sm:$0xff] %v1603_v0  ;;  %v1601_v3 = vadd.f32 %v1552_v1, %v1447_v47 }
 0xa66   : > { %v2101_v4 = vpop.f32.mrf.mxu1 }
 0xa67   : > { %1617 = vst [vmem:[#allocation2 + $0x68] sm:$0xff] %v1601_v3  ;;  %v1606_v6 = vadd.f32 %v2101_v4, %v1452_v36 }
 0xa68   : > { %v1565_v5 = vpop.f32.mrf.mxu1 }
 0xa69   : > { %1622 = vst [vmem:[#allocation2 + $0x10] sm:$0xff] %v1606_v6  ;;  %v1604_v22 = vadd.f32 %v1565_v5, %v1450_v39 }
 0xa6a   : > { %v2102_v7 = vpop.f32.mrf.mxu1 }
 0xa6b   : > { %1620 = vst [vmem:[#allocation2 + $0x40] sm:$0xff] %v1604_v22  ;;  %v1607_v8 = vadd.f32 %v2102_v7, %v1453_v37 }
 0xa6c   : > { %v1568_v19 = vpop.f32.mrf.mxu1 }
 0xa6d   : > { %1623 = vst [vmem:[#allocation2 + $0x38] sm:$0xff] %v1607_v8  ;;  %v1605_v13 = vadd.f32 %v1568_v19, %v1451_v40 }
 0xa6e   : > { %v2105_v16 = vpop.f32.mrf.mxu1 }
 0xa6f   : > { %1621 = vst [vmem:[#allocation2 + $0x20] sm:$0xff] %v1605_v13  ;;  %v1610_v32 = vadd.f32 %v2105_v16, %v1456_v30 }
 0xa70   : > { %v1581_v10 = vpop.f32.mrf.mxu1 }
 0xa71   : > { %1626 = vst [vmem:[#allocation2 + $0x78] sm:$0xff] %v1610_v32  ;;  %v1608_v35 = vadd.f32 %v1581_v10, %v1454_v33 }
 0xa72   : > { %v2106_v38 = vpop.f32.mrf.mxu1 }
 0xa73   : > { %1624 = vst [vmem:[#allocation2 + $0x60] sm:$0xff] %v1608_v35  ;;  %v1611_v41 = vadd.f32 %v2106_v38, %v1457_v31 }
 0xa74   : > { %v1584_v55 = vpop.f32.mrf.mxu1 }
 0xa75   : > { %1627 = vst [vmem:[#allocation2 + $0x28] sm:$0xff] %v1611_v41  ;;  %v1609_v59 = vadd.f32 %v1584_v55, %v1455_v34 }
 0xa77   : > { %1625 = vst [vmem:[#allocation2 + $0x70] sm:$0xff] %v1609_v59 }
 0xa78 PF: > { %s3213_s25 = sld [smem:[#allocation14_spill]]  ;;  %p2123_p3 = scmp.ge.s32.totalorder %s2494_s30, 2 }
 0xa7a   : > { %p2120_p8 = pnand %p2123_p3, %p2687_p4 }
 0xa7c   : > { %p2121_p9 = pneg %p2120_p8 }
 0xa7e   : > { %s1661_s21 = sand.u32 1, %s3213_s25  }
 0xa7f   : > { %s1662_s16 = scalar_lea.sflag [#allocation5], %s1661_s21 }
 0xa80   : > { %2441 = dma.done.wait (%p2121_p9), %s1662_s16, 256  }
 0xa81   : > { %2443 = vsyncadd (%p2121_p9), %s1662_s16, 4294967040  ;;  %s24_s30 = sadd.s32 1, %s2494_s30   ;;  %s3216_s14 = sld [smem:[#allocation25_spill]] }
 0xa82   : > { %p3113_p10 = scmp.ge.s32.totalorder %s24_s30, 10   ;;  %s3217_s13 = sld [smem:[#allocation15_spill]] }
 0xa83   : > { %s3218_s23 = sld [smem:[#allocation24_spill]]  ;;  %s3222_s18 = smov %s2450_s19 }
 0xa84   : > { %s3219_s5 = sld [smem:[#allocation19_spill]]  ;;  %s3223_s19 = smov %s2454_s20 }
 0xa85   : > { %s3220_s17 = sld [smem:[#allocation20_spill]]  ;;  %s3225_s21 = smov %s2462_s22 }
 0xa86   : > { %s3221_s0 = sld [smem:[#allocation22_spill]]  ;;  %s3227_s24 = smov %s2482_s27 }
 0xa87   : > { %s3224_s20 = smov %s3216_s14  ;;  %s3228_s25 = smov %s2486_s28 }
 0xa88   : > { %s3226_s22 = smov %s3217_s13  ;;  %s3229_s26 = smov %s2490_s29 }
 0xa89   :  { %23 = sbr.rel (!%p3113_p10) target bundleno = 15 (0xf), region = 162 }
 0xa8a   : > { %s3230_s27 = smov %s3219_s5 }
 0xa8b   : > { %s3231_s28 = smov %s3220_s17 }
 0xa8c   : > { %s3232_s29 = smov %s3221_s0 }
 0xa8e   :  { %1667 = vsyncpa [#allocation4], 1 }
 0xa8f   :  { %1669 = vsyncpa [#allocation4 + $0x1], 1 }
 0xa90   :  { %1670 = vsyncpa [#allocation8], 1 }
 0xa91   :  { %1672 = vsyncpa [#allocation8 + $0x1], 1 }
 0xa92   :  { %1673 = vsyncpa [#allocation5], 1 }
 0xa93   :  { %1675 = vsyncpa [#allocation5 + $0x1], 1 }

</bundles_post_ra>
